<compile_context>
chip_gen: v7x
topology: tpu7x:2x2x1
jax: 0.10.0
libtpu: 0.0.40
codegen_flags: <defaults>
</compile_context>

<pallas_src>
import math
import functools

import jax
import jax.numpy as jnp
import numpy as np
from jax import lax
from jax.experimental import pallas as pl
from jax.experimental.pallas import tpu as pltpu


# ----------------------------- kernel body -----------------------------------

def _task_attention_kernel(img_ref, task_ref, *refs,
                           bblk, n_img, n_task, embed_dim, fuse_kv):
    E = embed_dim
    out_ref = refs[-1]
    w_refs = refs[:-1]

    img = img_ref[...]                                  # (Bblk, N, E) bf16
    task = task_ref[...]                                # (Bblk, T, E) bf16

    # Flatten (batch, tokens) rows into one big 2-D MXU matmul (better occupancy).
    img2d = img.reshape(bblk * n_img, E)
    task2d = task.reshape(bblk * n_task, E)

    if fuse_kv:
        wq_ref, bq_ref, wkv_ref, bkv_ref = w_refs
        q2d = jnp.dot(img2d, wq_ref[...],
                      preferred_element_type=jnp.float32) + bq_ref[...]     # (Bblk*N, E)
        kv2d = jnp.dot(task2d, wkv_ref[...],
                       preferred_element_type=jnp.float32) + bkv_ref[...]   # (Bblk*T, 2E)
        k2d = kv2d[:, :E]       # slice lands on a 128-lane tile boundary (E % 128 == 0)
        v2d = kv2d[:, E:]
    else:
        # Small-E path: separate K/V matmuls, no lane-interior slicing.
        wq_ref, bq_ref, wk_ref, bk_ref, wv_ref, bv_ref = w_refs
        q2d = jnp.dot(img2d, wq_ref[...],
                      preferred_element_type=jnp.float32) + bq_ref[...]
        k2d = jnp.dot(task2d, wk_ref[...],
                      preferred_element_type=jnp.float32) + bk_ref[...]
        v2d = jnp.dot(task2d, wv_ref[...],
                      preferred_element_type=jnp.float32) + bv_ref[...]

    q = q2d.reshape(bblk, n_img, E)                     # f32
    k = k2d.reshape(bblk, n_task, E)                    # f32
    v = v2d.reshape(bblk, n_task, E)                    # f32

    # attn[b] = q[b] @ k[b]^T (scale already folded into Wq/bq); f32 operands —
    # this matmul is tiny, so no bf16 casts on the attention path.
    attn = lax.dot_general(q, k,
                           dimension_numbers=(((2,), (2,)), ((0,), (0,))),
                           preferred_element_type=jnp.float32)   # (Bblk, N, T)

    gate = jax.nn.sigmoid(attn)                         # f32 (EUP)

    if n_task <= 16:
        # T is tiny: the contraction gains nothing from the MXU; do an unrolled
        # VPU multiply-accumulate over task tokens instead of per-batch micro-matmuls.
        ctx = gate[:, :, 0:1] * v[:, 0:1, :]
        for t in range(1, n_task):
            ctx = ctx + gate[:, :, t:t + 1] * v[:, t:t + 1, :]
    else:
        ctx = lax.dot_general(gate, v,
                              dimension_numbers=(((2,), (1,)), ((0,), (0,))),
                              preferred_element_type=jnp.float32)

    # Residual add in f32, single cast on the store.
    out_ref[...] = (ctx + img.astype(jnp.float32)).astype(out_ref.dtype)


# ----------------------------- wrapper ----------------------------------------

def _pick_batch_block(B, N, T, E, token_bytes=2, target_block_bytes=4 << 20):
    """Largest divisor of B whose per-step I/O block is <= ~4 MiB and that leaves
    >= 2 grid steps (pipelining; both TensorCores on v7x)."""
    per_batch = (2 * N + T) * E * token_bytes          # img block + out block + task block
    cap = max(1, target_block_bytes // max(per_batch, 1))
    if B >= 2:
        cap = min(cap, B // 2)
    best = 1
    for d in range(1, B + 1):
        if B % d == 0 and d <= cap:
            best = d
    return best


def _vmem_limit_bytes(bblk, N, T, E, tok_bytes, out_bytes):
    io = bblk * (N * E + T * E) * tok_bytes + bblk * N * E * out_bytes
    w_bytes = 3 * E * E * 2 + 3 * E * 4                 # bf16 weights + f32 biases
    # f32 temporaries: q, k, v, attn, gate, ctx
    temps = 4 * bblk * (2 * N * E + 2 * T * E + 2 * N * T + N * E)
    est = 2 * io + 2 * w_bytes + temps                  # double-buffered I/O + margin
    return int(min(max(2 * est + (8 << 20), 24 << 20), 48 << 20))


def task_attention_pallas(task_token, image_token, params, *, batch_block=None):
    """task_token: (B, T, E), image_token: (B, N, E). Returns (B, N, E) in bf16."""
    B, T, E = task_token.shape
    B2, N, E2 = image_token.shape
    assert B == B2 and E == E2

    # HBM-bandwidth bound -> tokens and output travel as bf16 (no-op if already bf16).
    if task_token.dtype != jnp.bfloat16:
        task_token = task_token.astype(jnp.bfloat16)
    if image_token.dtype != jnp.bfloat16:
        image_token = image_token.astype(jnp.bfloat16)
    out_dtype = image_token.dtype

    fuse_kv = (len(params) == 4)                         # fused (E, 2E) KV weights

    if batch_block is None:
        batch_block = _pick_batch_block(B, N, T, E)
    assert B % batch_block == 0, "batch must be divisible by batch_block"
    grid = (B // batch_block,)

    kernel = functools.partial(_task_attention_kernel, bblk=batch_block,
                               n_img=N, n_task=T, embed_dim=E, fuse_kv=fuse_kv)

    tok_bytes = 2
    out_bytes = jnp.dtype(out_dtype).itemsize
    flops = 2 * B * (N * E * E + 2 * T * E * E + 2 * N * T * E)
    bytes_accessed = (B * (N + T) * E * tok_bytes + B * N * E * out_bytes
                      + 3 * E * E * 2 + 3 * E * 4)
    cost = pl.CostEstimate(flops=flops, transcendentals=B * N * T,
                           bytes_accessed=bytes_accessed)
    vmem_limit = _vmem_limit_bytes(batch_block, N, T, E, tok_bytes, out_bytes)

    def build(single_buffer_weights):
        def wspec(shape):
            if single_buffer_weights:
                return pl.BlockSpec(shape, lambda b: (0,) * len(shape),
                                    pipeline_mode=pl.Buffered(1))
            return pl.BlockSpec(shape, lambda b: (0,) * len(shape))

        if fuse_kv:
            weight_specs = [wspec((E, E)), wspec((1, E)),
                            wspec((E, 2 * E)), wspec((1, 2 * E))]
        else:
            weight_specs = [wspec((E, E)), wspec((1, E)),
                            wspec((E, E)), wspec((1, E)),
                            wspec((E, E)), wspec((1, E))]

        return pl.pallas_call(
            kernel,
            out_shape=jax.ShapeDtypeStruct((B, N, E), out_dtype),
            grid_spec=pltpu.PrefetchScalarGridSpec(
                num_scalar_prefetch=0,
                grid=grid,
                in_specs=[pl.BlockSpec((batch_block, N, E), lambda b: (b, 0, 0)),
                          pl.BlockSpec((batch_block, T, E), lambda b: (b, 0, 0))]
                         + weight_specs,
                out_specs=pl.BlockSpec((batch_block, N, E), lambda b: (b, 0, 0)),
            ),
            compiler_params=pltpu.CompilerParams(
                dimension_semantics=("parallel",),
                vmem_limit_bytes=vmem_limit),
            cost_estimate=cost,
        )(image_token, task_token, *params)

    try:
        return build(single_buffer_weights=True)
    except Exception:
        # pipeline_mode=pl.Buffered(1) not supported on this jax version ->
        # fall back to default double-buffered weight blocks (correctness identical).
        return build(single_buffer_weights=False)


# ----------------------------- params / reference -----------------------------

def init_raw_params(key, embed_dim):
    """torch.nn.Linear-style init (U(+/- 1/sqrt(fan_in))); weights stored (in, out)."""
    keys = jax.random.split(key, 6)
    bound = 1.0 / math.sqrt(embed_dim)

    def lin(kw, kb):
        w = jax.random.uniform(kw, (embed_dim, embed_dim), jnp.float32, -bound, bound)
        b = jax.random.uniform(kb, (1, embed_dim), jnp.float32, -bound, bound)
        return w, b

    wq, bq = lin(keys[0], keys[1])
    wk, bk = lin(keys[2], keys[3])
    wv, bv = lin(keys[4], keys[5])
    return wq, bq, wk, bk, wv, bv


def prepare_kernel_params(raw_params, embed_dim):
    """Host-side, one-time: fold 1/sqrt(E) into the query projection, cast weights to
    bf16 (biases stay f32).  K/V weights are fused into one (E, 2E) matmul only when E
    is a multiple of 128 (so the K/V split lands on a lane-tile boundary)."""
    wq, bq, wk, bk, wv, bv = raw_params
    scale = 1.0 / math.sqrt(embed_dim)
    wq_s = (wq * scale).astype(jnp.bfloat16)
    bq_s = (bq * scale).astype(jnp.float32)
    if embed_dim % 128 == 0:
        wkv = jnp.concatenate([wk, wv], axis=1).astype(jnp.bfloat16)    # (E, 2E)
        bkv = jnp.concatenate([bk, bv], axis=1).astype(jnp.float32)     # (1, 2E)
        return wq_s, bq_s, wkv, bkv
    return (wq_s, bq_s,
            wk.astype(jnp.bfloat16), bk.astype(jnp.float32),
            wv.astype(jnp.bfloat16), bv.astype(jnp.float32))


def reference(task_token, image_token, raw_params):
    wq, bq, wk, bk, wv, bv = raw_params
    q = image_token @ wq + bq
    k = task_token @ wk + bk
    v = task_token @ wv + bv
    attn = jnp.einsum("bnd,btd->bnt", q, k) / math.sqrt(q.shape[-1])
    return jnp.einsum("bnt,btd->bnd", jax.nn.sigmoid(attn), v) + image_token


# ----------------------------- test -------------------------------------------

if __name__ == "__main__":
    B, T, N, E = 2, 8, 16, 32   # batch, task tokens, image tokens, embed_dim
    key = jax.random.PRNGKey(0)
    k1, k2, k3 = jax.random.split(key, 3)

    raw_params = init_raw_params(k1, E)
    params = prepare_kernel_params(raw_params, E)
    # Tokens arrive in bf16 (the bandwidth-optimal transport dtype).
    task_token = jax.random.normal(k2, (B, T, E), jnp.float32).astype(jnp.bfloat16)
    image_token = jax.random.normal(k3, (B, N, E), jnp.float32).astype(jnp.bfloat16)

    out = task_attention_pallas(task_token, image_token, params)
    out = jax.block_until_ready(out)

    ref = reference(task_token.astype(jnp.float32),
                    image_token.astype(jnp.float32), raw_params)
    assert out.shape == (B, N, E)
    # bf16 weights/tokens/output with f32 accumulation -> bf16-level tolerance.
    np.testing.assert_allclose(np.asarray(out.astype(jnp.float32)),
                               np.asarray(ref), rtol=5e-2, atol=5e-2)

    print("KERNEL_OK")
</pallas_src>

<mosaic_0001>
module attributes {stable_mosaic.version = 11 : i64} {
  func.func @_task_attention_kernel(%arg0: i32, %arg1: memref<1x16x32xbf16, #tpu.memory_space<vmem>>, %arg2: memref<1x8x32xbf16, #tpu.memory_space<vmem>>, %arg3: memref<32x32xbf16, #tpu.memory_space<vmem>>, %arg4: memref<1x32xf32, #tpu.memory_space<vmem>>, %arg5: memref<32x32xbf16, #tpu.memory_space<vmem>>, %arg6: memref<1x32xf32, #tpu.memory_space<vmem>>, %arg7: memref<32x32xbf16, #tpu.memory_space<vmem>>, %arg8: memref<1x32xf32, #tpu.memory_space<vmem>>, %arg9: memref<1x16x32xbf16, #tpu.memory_space<vmem>>) attributes {dimension_semantics = [#tpu.dimension_semantics<parallel>], iteration_bounds = array<i64: 2>, scalar_prefetch = 0 : i64, scratch_operands = 0 : i64, tpu.core_type = #tpu.core_type<tc>, window_params = [{transform_indices = @transform_0, window_bounds = array<i64: 1, 16, 32>}, {transform_indices = @transform_1, window_bounds = array<i64: 1, 8, 32>}, {pipeline_mode = #tpu.pipeline_mode<synchronous>, transform_indices = @transform_2, window_bounds = array<i64: 32, 32>}, {pipeline_mode = #tpu.pipeline_mode<synchronous>, transform_indices = @transform_3, window_bounds = array<i64: 1, 32>}, {pipeline_mode = #tpu.pipeline_mode<synchronous>, transform_indices = @transform_4, window_bounds = array<i64: 32, 32>}, {pipeline_mode = #tpu.pipeline_mode<synchronous>, transform_indices = @transform_5, window_bounds = array<i64: 1, 32>}, {pipeline_mode = #tpu.pipeline_mode<synchronous>, transform_indices = @transform_6, window_bounds = array<i64: 32, 32>}, {pipeline_mode = #tpu.pipeline_mode<synchronous>, transform_indices = @transform_7, window_bounds = array<i64: 1, 32>}, {transform_indices = @transform_8, window_bounds = array<i64: 1, 16, 32>}]} {
    %c0 = arith.constant 0 : index
    %c0_0 = arith.constant 0 : index
    %c0_1 = arith.constant 0 : index
    %0 = vector.load %arg1[%c0, %c0_0, %c0_1] : memref<1x16x32xbf16, #tpu.memory_space<vmem>>, vector<1x16x32xbf16>
    %c0_2 = arith.constant 0 : index
    %c0_3 = arith.constant 0 : index
    %c0_4 = arith.constant 0 : index
    %1 = vector.load %arg2[%c0_2, %c0_3, %c0_4] : memref<1x8x32xbf16, #tpu.memory_space<vmem>>, vector<1x8x32xbf16>
    %2 = vector.shape_cast %0 : vector<1x16x32xbf16> to vector<16x32xbf16>
    %3 = vector.shape_cast %1 : vector<1x8x32xbf16> to vector<8x32xbf16>
    %c0_5 = arith.constant 0 : index
    %c0_6 = arith.constant 0 : index
    %4 = vector.load %arg3[%c0_5, %c0_6] : memref<32x32xbf16, #tpu.memory_space<vmem>>, vector<32x32xbf16>
    %cst = arith.constant dense<0.000000e+00> : vector<16x32xf32>
    %5 = tpu.matmul %2, %4, %cst {dimension_numbers = #tpu.dot_dimension_numbers<[1], [0], [0], [1], [0, 0, 1, 1], [], []>} : vector<16x32xbf16>, vector<32x32xbf16>, vector<16x32xf32> -> vector<16x32xf32>
    %c0_7 = arith.constant 0 : index
    %c0_8 = arith.constant 0 : index
    %6 = vector.load %arg4[%c0_7, %c0_8] : memref<1x32xf32, #tpu.memory_space<vmem>>, vector<1x32xf32>
    %7 = vector.broadcast %6 : vector<1x32xf32> to vector<16x32xf32>
    %8 = arith.addf %5, %7 : vector<16x32xf32>
    %c0_9 = arith.constant 0 : index
    %c0_10 = arith.constant 0 : index
    %9 = vector.load %arg5[%c0_9, %c0_10] : memref<32x32xbf16, #tpu.memory_space<vmem>>, vector<32x32xbf16>
    %cst_11 = arith.constant dense<0.000000e+00> : vector<8x32xf32>
    %10 = tpu.matmul %3, %9, %cst_11 {dimension_numbers = #tpu.dot_dimension_numbers<[1], [0], [0], [1], [0, 0, 1, 1], [], []>} : vector<8x32xbf16>, vector<32x32xbf16>, vector<8x32xf32> -> vector<8x32xf32>
    %c0_12 = arith.constant 0 : index
    %c0_13 = arith.constant 0 : index
    %11 = vector.load %arg6[%c0_12, %c0_13] : memref<1x32xf32, #tpu.memory_space<vmem>>, vector<1x32xf32>
    %12 = vector.broadcast %11 : vector<1x32xf32> to vector<8x32xf32>
    %13 = arith.addf %10, %12 : vector<8x32xf32>
    %c0_14 = arith.constant 0 : index
    %c0_15 = arith.constant 0 : index
    %14 = vector.load %arg7[%c0_14, %c0_15] : memref<32x32xbf16, #tpu.memory_space<vmem>>, vector<32x32xbf16>
    %cst_16 = arith.constant dense<0.000000e+00> : vector<8x32xf32>
    %15 = tpu.matmul %3, %14, %cst_16 {dimension_numbers = #tpu.dot_dimension_numbers<[1], [0], [0], [1], [0, 0, 1, 1], [], []>} : vector<8x32xbf16>, vector<32x32xbf16>, vector<8x32xf32> -> vector<8x32xf32>
    %c0_17 = arith.constant 0 : index
    %c0_18 = arith.constant 0 : index
    %16 = vector.load %arg8[%c0_17, %c0_18] : memref<1x32xf32, #tpu.memory_space<vmem>>, vector<1x32xf32>
    %17 = vector.broadcast %16 : vector<1x32xf32> to vector<8x32xf32>
    %18 = arith.addf %15, %17 : vector<8x32xf32>
    %19 = vector.shape_cast %8 : vector<16x32xf32> to vector<1x16x32xf32>
    %20 = vector.shape_cast %13 : vector<8x32xf32> to vector<1x8x32xf32>
    %21 = vector.shape_cast %18 : vector<8x32xf32> to vector<1x8x32xf32>
    %cst_19 = arith.constant dense<0.000000e+00> : vector<1x16x8xf32>
    %22 = tpu.matmul %19, %20, %cst_19 {dimension_numbers = #tpu.dot_dimension_numbers<[2], [2], [1], [1], [0, 0, 0, 1, 1, 1], [0], [0]>} : vector<1x16x32xf32>, vector<1x8x32xf32>, vector<1x16x8xf32> -> vector<1x16x8xf32>
    %23 = arith.negf %22 : vector<1x16x8xf32>
    %24 = math.exp %23 : vector<1x16x8xf32>
    %cst_20 = arith.constant 1.000000e+00 : f32
    %25 = vector.broadcast %cst_20 : f32 to vector<1x16x8xf32>
    %26 = arith.addf %25, %24 : vector<1x16x8xf32>
    %27 = arith.divf %25, %26 : vector<1x16x8xf32>
    %28 = vector.extract_strided_slice %27 {offsets = [0, 0, 0], sizes = [1, 16, 1], strides = [1, 1, 1]} : vector<1x16x8xf32> to vector<1x16x1xf32>
    %29 = vector.extract_strided_slice %21 {offsets = [0, 0, 0], sizes = [1, 1, 32], strides = [1, 1, 1]} : vector<1x8x32xf32> to vector<1x1x32xf32>
    %30 = vector.broadcast %28 : vector<1x16x1xf32> to vector<1x16x32xf32>
    %31 = vector.broadcast %29 : vector<1x1x32xf32> to vector<1x16x32xf32>
    %32 = arith.mulf %30, %31 : vector<1x16x32xf32>
    %33 = vector.extract_strided_slice %27 {offsets = [0, 0, 1], sizes = [1, 16, 1], strides = [1, 1, 1]} : vector<1x16x8xf32> to vector<1x16x1xf32>
    %34 = vector.extract_strided_slice %21 {offsets = [0, 1, 0], sizes = [1, 1, 32], strides = [1, 1, 1]} : vector<1x8x32xf32> to vector<1x1x32xf32>
    %35 = vector.broadcast %33 : vector<1x16x1xf32> to vector<1x16x32xf32>
    %36 = vector.broadcast %34 : vector<1x1x32xf32> to vector<1x16x32xf32>
    %37 = arith.mulf %35, %36 : vector<1x16x32xf32>
    %38 = arith.addf %32, %37 : vector<1x16x32xf32>
    %39 = vector.extract_strided_slice %27 {offsets = [0, 0, 2], sizes = [1, 16, 1], strides = [1, 1, 1]} : vector<1x16x8xf32> to vector<1x16x1xf32>
    %40 = vector.extract_strided_slice %21 {offsets = [0, 2, 0], sizes = [1, 1, 32], strides = [1, 1, 1]} : vector<1x8x32xf32> to vector<1x1x32xf32>
    %41 = vector.broadcast %39 : vector<1x16x1xf32> to vector<1x16x32xf32>
    %42 = vector.broadcast %40 : vector<1x1x32xf32> to vector<1x16x32xf32>
    %43 = arith.mulf %41, %42 : vector<1x16x32xf32>
    %44 = arith.addf %38, %43 : vector<1x16x32xf32>
    %45 = vector.extract_strided_slice %27 {offsets = [0, 0, 3], sizes = [1, 16, 1], strides = [1, 1, 1]} : vector<1x16x8xf32> to vector<1x16x1xf32>
    %46 = vector.extract_strided_slice %21 {offsets = [0, 3, 0], sizes = [1, 1, 32], strides = [1, 1, 1]} : vector<1x8x32xf32> to vector<1x1x32xf32>
    %47 = vector.broadcast %45 : vector<1x16x1xf32> to vector<1x16x32xf32>
    %48 = vector.broadcast %46 : vector<1x1x32xf32> to vector<1x16x32xf32>
    %49 = arith.mulf %47, %48 : vector<1x16x32xf32>
    %50 = arith.addf %44, %49 : vector<1x16x32xf32>
    %51 = vector.extract_strided_slice %27 {offsets = [0, 0, 4], sizes = [1, 16, 1], strides = [1, 1, 1]} : vector<1x16x8xf32> to vector<1x16x1xf32>
    %52 = vector.extract_strided_slice %21 {offsets = [0, 4, 0], sizes = [1, 1, 32], strides = [1, 1, 1]} : vector<1x8x32xf32> to vector<1x1x32xf32>
    %53 = vector.broadcast %51 : vector<1x16x1xf32> to vector<1x16x32xf32>
    %54 = vector.broadcast %52 : vector<1x1x32xf32> to vector<1x16x32xf32>
    %55 = arith.mulf %53, %54 : vector<1x16x32xf32>
    %56 = arith.addf %50, %55 : vector<1x16x32xf32>
    %57 = vector.extract_strided_slice %27 {offsets = [0, 0, 5], sizes = [1, 16, 1], strides = [1, 1, 1]} : vector<1x16x8xf32> to vector<1x16x1xf32>
    %58 = vector.extract_strided_slice %21 {offsets = [0, 5, 0], sizes = [1, 1, 32], strides = [1, 1, 1]} : vector<1x8x32xf32> to vector<1x1x32xf32>
    %59 = vector.broadcast %57 : vector<1x16x1xf32> to vector<1x16x32xf32>
    %60 = vector.broadcast %58 : vector<1x1x32xf32> to vector<1x16x32xf32>
    %61 = arith.mulf %59, %60 : vector<1x16x32xf32>
    %62 = arith.addf %56, %61 : vector<1x16x32xf32>
    %63 = vector.extract_strided_slice %27 {offsets = [0, 0, 6], sizes = [1, 16, 1], strides = [1, 1, 1]} : vector<1x16x8xf32> to vector<1x16x1xf32>
    %64 = vector.extract_strided_slice %21 {offsets = [0, 6, 0], sizes = [1, 1, 32], strides = [1, 1, 1]} : vector<1x8x32xf32> to vector<1x1x32xf32>
    %65 = vector.broadcast %63 : vector<1x16x1xf32> to vector<1x16x32xf32>
    %66 = vector.broadcast %64 : vector<1x1x32xf32> to vector<1x16x32xf32>
    %67 = arith.mulf %65, %66 : vector<1x16x32xf32>
    %68 = arith.addf %62, %67 : vector<1x16x32xf32>
    %69 = vector.extract_strided_slice %27 {offsets = [0, 0, 7], sizes = [1, 16, 1], strides = [1, 1, 1]} : vector<1x16x8xf32> to vector<1x16x1xf32>
    %70 = vector.extract_strided_slice %21 {offsets = [0, 7, 0], sizes = [1, 1, 32], strides = [1, 1, 1]} : vector<1x8x32xf32> to vector<1x1x32xf32>
    %71 = vector.broadcast %69 : vector<1x16x1xf32> to vector<1x16x32xf32>
    %72 = vector.broadcast %70 : vector<1x1x32xf32> to vector<1x16x32xf32>
    %73 = arith.mulf %71, %72 : vector<1x16x32xf32>
    %74 = arith.addf %68, %73 : vector<1x16x32xf32>
    %75 = arith.extf %0 : vector<1x16x32xbf16> to vector<1x16x32xf32>
    %76 = arith.addf %74, %75 : vector<1x16x32xf32>
    %77 = arith.truncf %76 : vector<1x16x32xf32> to vector<1x16x32xbf16>
    %c0_21 = arith.constant 0 : index
    %c0_22 = arith.constant 0 : index
    %c0_23 = arith.constant 0 : index
    %78 = vector.load %arg9[%c0_21, %c0_22, %c0_23] : memref<1x16x32xbf16, #tpu.memory_space<vmem>>, vector<1x16x32xbf16>
    tpu.vector_store %arg9[%c0_21, %c0_22, %c0_23], %77 {strides = array<i32>} : memref<1x16x32xbf16, #tpu.memory_space<vmem>>, vector<1x16x32xbf16>,
    return
  }
  func.func @transform_0(%arg0: i32) -> (i32, i32, i32) {
    %c0_i32 = arith.constant 0 : i32
    %c0_i32_0 = arith.constant 0 : i32
    %c0_i32_1 = arith.constant 0 : i32
    return %arg0, %c0_i32, %c0_i32_0 : i32, i32, i32
  }
  func.func @transform_1(%arg0: i32) -> (i32, i32, i32) {
    %c0_i32 = arith.constant 0 : i32
    %c0_i32_0 = arith.constant 0 : i32
    %c0_i32_1 = arith.constant 0 : i32
    return %arg0, %c0_i32, %c0_i32_0 : i32, i32, i32
  }
  func.func @transform_2(%arg0: i32) -> (i32, i32) {
    %c0_i32 = arith.constant 0 : i32
    %c0_i32_0 = arith.constant 0 : i32
    %c0_i32_1 = arith.constant 0 : i32
    return %c0_i32, %c0_i32_0 : i32, i32
  }
  func.func @transform_3(%arg0: i32) -> (i32, i32) {
    %c0_i32 = arith.constant 0 : i32
    %c0_i32_0 = arith.constant 0 : i32
    %c0_i32_1 = arith.constant 0 : i32
    return %c0_i32, %c0_i32_0 : i32, i32
  }
  func.func @transform_4(%arg0: i32) -> (i32, i32) {
    %c0_i32 = arith.constant 0 : i32
    %c0_i32_0 = arith.constant 0 : i32
    %c0_i32_1 = arith.constant 0 : i32
    return %c0_i32, %c0_i32_0 : i32, i32
  }
  func.func @transform_5(%arg0: i32) -> (i32, i32) {
    %c0_i32 = arith.constant 0 : i32
    %c0_i32_0 = arith.constant 0 : i32
    %c0_i32_1 = arith.constant 0 : i32
    return %c0_i32, %c0_i32_0 : i32, i32
  }
  func.func @transform_6(%arg0: i32) -> (i32, i32) {
    %c0_i32 = arith.constant 0 : i32
    %c0_i32_0 = arith.constant 0 : i32
    %c0_i32_1 = arith.constant 0 : i32
    return %c0_i32, %c0_i32_0 : i32, i32
  }
  func.func @transform_7(%arg0: i32) -> (i32, i32) {
    %c0_i32 = arith.constant 0 : i32
    %c0_i32_0 = arith.constant 0 : i32
    %c0_i32_1 = arith.constant 0 : i32
    return %c0_i32, %c0_i32_0 : i32, i32
  }
  func.func @transform_8(%arg0: i32) -> (i32, i32, i32) {
    %c0_i32 = arith.constant 0 : i32
    %c0_i32_0 = arith.constant 0 : i32
    %c0_i32_1 = arith.constant 0 : i32
    return %arg0, %c0_i32, %c0_i32_0 : i32, i32, i32
  }
}

module attributes {stable_mosaic.version = 11 : i64} {
  func.func @_task_attention_kernel(%arg0: i32, %arg1: memref<1x16x32xbf16, #tpu.memory_space<vmem>>, %arg2: memref<1x8x32xbf16, #tpu.memory_space<vmem>>, %arg3: memref<32x32xbf16, #tpu.memory_space<vmem>>, %arg4: memref<1x32xf32, #tpu.memory_space<vmem>>, %arg5: memref<32x32xbf16, #tpu.memory_space<vmem>>, %arg6: memref<1x32xf32, #tpu.memory_space<vmem>>, %arg7: memref<32x32xbf16, #tpu.memory_space<vmem>>, %arg8: memref<1x32xf32, #tpu.memory_space<vmem>>, %arg9: memref<1x16x32xbf16, #tpu.memory_space<vmem>>) attributes {dimension_semantics = [#tpu.dimension_semantics<parallel>], iteration_bounds = array<i64: 2>, scalar_prefetch = 0 : i64, scratch_operands = 0 : i64, tpu.core_type = #tpu.core_type<tc>, window_params = [{transform_indices = @transform_0, window_bounds = array<i64: 1, 16, 32>}, {transform_indices = @transform_1, window_bounds = array<i64: 1, 8, 32>}, {pipeline_mode = #tpu.pipeline_mode<synchronous>, transform_indices = @transform_2, window_bounds = array<i64: 32, 32>}, {pipeline_mode = #tpu.pipeline_mode<synchronous>, transform_indices = @transform_3, window_bounds = array<i64: 1, 32>}, {pipeline_mode = #tpu.pipeline_mode<synchronous>, transform_indices = @transform_4, window_bounds = array<i64: 32, 32>}, {pipeline_mode = #tpu.pipeline_mode<synchronous>, transform_indices = @transform_5, window_bounds = array<i64: 1, 32>}, {pipeline_mode = #tpu.pipeline_mode<synchronous>, transform_indices = @transform_6, window_bounds = array<i64: 32, 32>}, {pipeline_mode = #tpu.pipeline_mode<synchronous>, transform_indices = @transform_7, window_bounds = array<i64: 1, 32>}, {transform_indices = @transform_8, window_bounds = array<i64: 1, 16, 32>}]} {
    %c0 = arith.constant 0 : index
    %c0_0 = arith.constant 0 : index
    %c0_1 = arith.constant 0 : index
    %0 = vector.load %arg1[%c0, %c0_0, %c0_1] : memref<1x16x32xbf16, #tpu.memory_space<vmem>>, vector<1x16x32xbf16>
    %c0_2 = arith.constant 0 : index
    %c0_3 = arith.constant 0 : index
    %c0_4 = arith.constant 0 : index
    %1 = vector.load %arg2[%c0_2, %c0_3, %c0_4] : memref<1x8x32xbf16, #tpu.memory_space<vmem>>, vector<1x8x32xbf16>
    %2 = vector.shape_cast %0 : vector<1x16x32xbf16> to vector<16x32xbf16>
    %3 = vector.shape_cast %1 : vector<1x8x32xbf16> to vector<8x32xbf16>
    %c0_5 = arith.constant 0 : index
    %c0_6 = arith.constant 0 : index
    %4 = vector.load %arg3[%c0_5, %c0_6] : memref<32x32xbf16, #tpu.memory_space<vmem>>, vector<32x32xbf16>
    %cst = arith.constant dense<0.000000e+00> : vector<16x32xf32>
    %5 = tpu.matmul %2, %4, %cst {dimension_numbers = #tpu.dot_dimension_numbers<[1], [0], [0], [1], [0, 0, 1, 1], [], []>} : vector<16x32xbf16>, vector<32x32xbf16>, vector<16x32xf32> -> vector<16x32xf32>
    %c0_7 = arith.constant 0 : index
    %c0_8 = arith.constant 0 : index
    %6 = vector.load %arg4[%c0_7, %c0_8] : memref<1x32xf32, #tpu.memory_space<vmem>>, vector<1x32xf32>
    %7 = vector.broadcast %6 : vector<1x32xf32> to vector<16x32xf32>
    %8 = arith.addf %5, %7 : vector<16x32xf32>
    %c0_9 = arith.constant 0 : index
    %c0_10 = arith.constant 0 : index
    %9 = vector.load %arg5[%c0_9, %c0_10] : memref<32x32xbf16, #tpu.memory_space<vmem>>, vector<32x32xbf16>
    %cst_11 = arith.constant dense<0.000000e+00> : vector<8x32xf32>
    %10 = tpu.matmul %3, %9, %cst_11 {dimension_numbers = #tpu.dot_dimension_numbers<[1], [0], [0], [1], [0, 0, 1, 1], [], []>} : vector<8x32xbf16>, vector<32x32xbf16>, vector<8x32xf32> -> vector<8x32xf32>
    %c0_12 = arith.constant 0 : index
    %c0_13 = arith.constant 0 : index
    %11 = vector.load %arg6[%c0_12, %c0_13] : memref<1x32xf32, #tpu.memory_space<vmem>>, vector<1x32xf32>
    %12 = vector.broadcast %11 : vector<1x32xf32> to vector<8x32xf32>
    %13 = arith.addf %10, %12 : vector<8x32xf32>
    %c0_14 = arith.constant 0 : index
    %c0_15 = arith.constant 0 : index
    %14 = vector.load %arg7[%c0_14, %c0_15] : memref<32x32xbf16, #tpu.memory_space<vmem>>, vector<32x32xbf16>
    %cst_16 = arith.constant dense<0.000000e+00> : vector<8x32xf32>
    %15 = tpu.matmul %3, %14, %cst_16 {dimension_numbers = #tpu.dot_dimension_numbers<[1], [0], [0], [1], [0, 0, 1, 1], [], []>} : vector<8x32xbf16>, vector<32x32xbf16>, vector<8x32xf32> -> vector<8x32xf32>
    %c0_17 = arith.constant 0 : index
    %c0_18 = arith.constant 0 : index
    %16 = vector.load %arg8[%c0_17, %c0_18] : memref<1x32xf32, #tpu.memory_space<vmem>>, vector<1x32xf32>
    %17 = vector.broadcast %16 : vector<1x32xf32> to vector<8x32xf32>
    %18 = arith.addf %15, %17 : vector<8x32xf32>
    %19 = vector.shape_cast %8 : vector<16x32xf32> to vector<1x16x32xf32>
    %20 = vector.shape_cast %13 : vector<8x32xf32> to vector<1x8x32xf32>
    %21 = vector.shape_cast %18 : vector<8x32xf32> to vector<1x8x32xf32>
    %cst_19 = arith.constant dense<0.000000e+00> : vector<1x16x8xf32>
    %22 = tpu.matmul %19, %20, %cst_19 {dimension_numbers = #tpu.dot_dimension_numbers<[2], [2], [1], [1], [0, 0, 0, 1, 1, 1], [0], [0]>} : vector<1x16x32xf32>, vector<1x8x32xf32>, vector<1x16x8xf32> -> vector<1x16x8xf32>
    %23 = arith.negf %22 : vector<1x16x8xf32>
    %24 = math.exp %23 : vector<1x16x8xf32>
    %cst_20 = arith.constant 1.000000e+00 : f32
    %25 = vector.broadcast %cst_20 : f32 to vector<1x16x8xf32>
    %26 = arith.addf %25, %24 : vector<1x16x8xf32>
    %27 = arith.divf %25, %26 : vector<1x16x8xf32>
    %28 = vector.extract_strided_slice %27 {offsets = [0, 0, 0], sizes = [1, 16, 1], strides = [1, 1, 1]} : vector<1x16x8xf32> to vector<1x16x1xf32>
    %29 = vector.extract_strided_slice %21 {offsets = [0, 0, 0], sizes = [1, 1, 32], strides = [1, 1, 1]} : vector<1x8x32xf32> to vector<1x1x32xf32>
    %30 = vector.broadcast %28 : vector<1x16x1xf32> to vector<1x16x32xf32>
    %31 = vector.broadcast %29 : vector<1x1x32xf32> to vector<1x16x32xf32>
    %32 = arith.mulf %30, %31 : vector<1x16x32xf32>
    %33 = vector.extract_strided_slice %27 {offsets = [0, 0, 1], sizes = [1, 16, 1], strides = [1, 1, 1]} : vector<1x16x8xf32> to vector<1x16x1xf32>
    %34 = vector.extract_strided_slice %21 {offsets = [0, 1, 0], sizes = [1, 1, 32], strides = [1, 1, 1]} : vector<1x8x32xf32> to vector<1x1x32xf32>
    %35 = vector.broadcast %33 : vector<1x16x1xf32> to vector<1x16x32xf32>
    %36 = vector.broadcast %34 : vector<1x1x32xf32> to vector<1x16x32xf32>
    %37 = arith.mulf %35, %36 : vector<1x16x32xf32>
    %38 = arith.addf %32, %37 : vector<1x16x32xf32>
    %39 = vector.extract_strided_slice %27 {offsets = [0, 0, 2], sizes = [1, 16, 1], strides = [1, 1, 1]} : vector<1x16x8xf32> to vector<1x16x1xf32>
    %40 = vector.extract_strided_slice %21 {offsets = [0, 2, 0], sizes = [1, 1, 32], strides = [1, 1, 1]} : vector<1x8x32xf32> to vector<1x1x32xf32>
    %41 = vector.broadcast %39 : vector<1x16x1xf32> to vector<1x16x32xf32>
    %42 = vector.broadcast %40 : vector<1x1x32xf32> to vector<1x16x32xf32>
    %43 = arith.mulf %41, %42 : vector<1x16x32xf32>
    %44 = arith.addf %38, %43 : vector<1x16x32xf32>
    %45 = vector.extract_strided_slice %27 {offsets = [0, 0, 3], sizes = [1, 16, 1], strides = [1, 1, 1]} : vector<1x16x8xf32> to vector<1x16x1xf32>
    %46 = vector.extract_strided_slice %21 {offsets = [0, 3, 0], sizes = [1, 1, 32], strides = [1, 1, 1]} : vector<1x8x32xf32> to vector<1x1x32xf32>
    %47 = vector.broadcast %45 : vector<1x16x1xf32> to vector<1x16x32xf32>
    %48 = vector.broadcast %46 : vector<1x1x32xf32> to vector<1x16x32xf32>
    %49 = arith.mulf %47, %48 : vector<1x16x32xf32>
    %50 = arith.addf %44, %49 : vector<1x16x32xf32>
    %51 = vector.extract_strided_slice %27 {offsets = [0, 0, 4], sizes = [1, 16, 1], strides = [1, 1, 1]} : vector<1x16x8xf32> to vector<1x16x1xf32>
    %52 = vector.extract_strided_slice %21 {offsets = [0, 4, 0], sizes = [1, 1, 32], strides = [1, 1, 1]} : vector<1x8x32xf32> to vector<1x1x32xf32>
    %53 = vector.broadcast %51 : vector<1x16x1xf32> to vector<1x16x32xf32>
    %54 = vector.broadcast %52 : vector<1x1x32xf32> to vector<1x16x32xf32>
    %55 = arith.mulf %53, %54 : vector<1x16x32xf32>
    %56 = arith.addf %50, %55 : vector<1x16x32xf32>
    %57 = vector.extract_strided_slice %27 {offsets = [0, 0, 5], sizes = [1, 16, 1], strides = [1, 1, 1]} : vector<1x16x8xf32> to vector<1x16x1xf32>
    %58 = vector.extract_strided_slice %21 {offsets = [0, 5, 0], sizes = [1, 1, 32], strides = [1, 1, 1]} : vector<1x8x32xf32> to vector<1x1x32xf32>
    %59 = vector.broadcast %57 : vector<1x16x1xf32> to vector<1x16x32xf32>
    %60 = vector.broadcast %58 : vector<1x1x32xf32> to vector<1x16x32xf32>
    %61 = arith.mulf %59, %60 : vector<1x16x32xf32>
    %62 = arith.addf %56, %61 : vector<1x16x32xf32>
    %63 = vector.extract_strided_slice %27 {offsets = [0, 0, 6], sizes = [1, 16, 1], strides = [1, 1, 1]} : vector<1x16x8xf32> to vector<1x16x1xf32>
    %64 = vector.extract_strided_slice %21 {offsets = [0, 6, 0], sizes = [1, 1, 32], strides = [1, 1, 1]} : vector<1x8x32xf32> to vector<1x1x32xf32>
    %65 = vector.broadcast %63 : vector<1x16x1xf32> to vector<1x16x32xf32>
    %66 = vector.broadcast %64 : vector<1x1x32xf32> to vector<1x16x32xf32>
    %67 = arith.mulf %65, %66 : vector<1x16x32xf32>
    %68 = arith.addf %62, %67 : vector<1x16x32xf32>
    %69 = vector.extract_strided_slice %27 {offsets = [0, 0, 7], sizes = [1, 16, 1], strides = [1, 1, 1]} : vector<1x16x8xf32> to vector<1x16x1xf32>
    %70 = vector.extract_strided_slice %21 {offsets = [0, 7, 0], sizes = [1, 1, 32], strides = [1, 1, 1]} : vector<1x8x32xf32> to vector<1x1x32xf32>
    %71 = vector.broadcast %69 : vector<1x16x1xf32> to vector<1x16x32xf32>
    %72 = vector.broadcast %70 : vector<1x1x32xf32> to vector<1x16x32xf32>
    %73 = arith.mulf %71, %72 : vector<1x16x32xf32>
    %74 = arith.addf %68, %73 : vector<1x16x32xf32>
    %75 = arith.extf %0 : vector<1x16x32xbf16> to vector<1x16x32xf32>
    %76 = arith.addf %74, %75 : vector<1x16x32xf32>
    %77 = arith.truncf %76 : vector<1x16x32xf32> to vector<1x16x32xbf16>
    %c0_21 = arith.constant 0 : index
    %c0_22 = arith.constant 0 : index
    %c0_23 = arith.constant 0 : index
    %78 = vector.load %arg9[%c0_21, %c0_22, %c0_23] : memref<1x16x32xbf16, #tpu.memory_space<vmem>>, vector<1x16x32xbf16>
    tpu.vector_store %arg9[%c0_21, %c0_22, %c0_23], %77 {strides = array<i32>} : memref<1x16x32xbf16, #tpu.memory_space<vmem>>, vector<1x16x32xbf16>,
    return
  }
  func.func @transform_0(%arg0: i32) -> (i32, i32, i32) {
    %c0_i32 = arith.constant 0 : i32
    %c0_i32_0 = arith.constant 0 : i32
    %c0_i32_1 = arith.constant 0 : i32
    return %arg0, %c0_i32, %c0_i32_0 : i32, i32, i32
  }
  func.func @transform_1(%arg0: i32) -> (i32, i32, i32) {
    %c0_i32 = arith.constant 0 : i32
    %c0_i32_0 = arith.constant 0 : i32
    %c0_i32_1 = arith.constant 0 : i32
    return %arg0, %c0_i32, %c0_i32_0 : i32, i32, i32
  }
  func.func @transform_2(%arg0: i32) -> (i32, i32) {
    %c0_i32 = arith.constant 0 : i32
    %c0_i32_0 = arith.constant 0 : i32
    %c0_i32_1 = arith.constant 0 : i32
    return %c0_i32, %c0_i32_0 : i32, i32
  }
  func.func @transform_3(%arg0: i32) -> (i32, i32) {
    %c0_i32 = arith.constant 0 : i32
    %c0_i32_0 = arith.constant 0 : i32
    %c0_i32_1 = arith.constant 0 : i32
    return %c0_i32, %c0_i32_0 : i32, i32
  }
  func.func @transform_4(%arg0: i32) -> (i32, i32) {
    %c0_i32 = arith.constant 0 : i32
    %c0_i32_0 = arith.constant 0 : i32
    %c0_i32_1 = arith.constant 0 : i32
    return %c0_i32, %c0_i32_0 : i32, i32
  }
  func.func @transform_5(%arg0: i32) -> (i32, i32) {
    %c0_i32 = arith.constant 0 : i32
    %c0_i32_0 = arith.constant 0 : i32
    %c0_i32_1 = arith.constant 0 : i32
    return %c0_i32, %c0_i32_0 : i32, i32
  }
  func.func @transform_6(%arg0: i32) -> (i32, i32) {
    %c0_i32 = arith.constant 0 : i32
    %c0_i32_0 = arith.constant 0 : i32
    %c0_i32_1 = arith.constant 0 : i32
    return %c0_i32, %c0_i32_0 : i32, i32
  }
  func.func @transform_7(%arg0: i32) -> (i32, i32) {
    %c0_i32 = arith.constant 0 : i32
    %c0_i32_0 = arith.constant 0 : i32
    %c0_i32_1 = arith.constant 0 : i32
    return %c0_i32, %c0_i32_0 : i32, i32
  }
  func.func @transform_8(%arg0: i32) -> (i32, i32, i32) {
    %c0_i32 = arith.constant 0 : i32
    %c0_i32_0 = arith.constant 0 : i32
    %c0_i32_1 = arith.constant 0 : i32
    return %arg0, %c0_i32, %c0_i32_0 : i32, i32, i32
  }
}

</mosaic_0001>

<bundles_post_ra>
// kernel: tpu_custom_call.1
= control target key start
LH: loop header
LB: loop body
LE: loop exit
PB: predicated region body
PF: predicated region fallthrough
CT: control target
= control target key end

     0   :  { %s1749_s0 = inlined_call_operand.hbm [shape: bf16[2,16,32], index: 0, kind: input, shape index: {}]   ;;  %s1750_s1 = inlined_call_operand.hbm [shape: bf16[2,8,32], index: 1, kind: input, shape index: {}]   ;;  %s1751_s2 = inlined_call_operand.hbm [shape: bf16[32,32], index: 2, kind: input, shape index: {}]   ;;  %s1752_s3 = inlined_call_operand.vmem [shape: f32[1,32], index: 3, kind: input, shape index: {}]   ;;  %s1753_s4 = inlined_call_operand.hbm [shape: bf16[32,32], index: 4, kind: input, shape index: {}]   ;;  %s1754_s5 = inlined_call_operand.vmem [shape: f32[1,32], index: 5, kind: input, shape index: {}]   ;;  %s1755_s6 = inlined_call_operand.vmem [shape: bf16[32,32], index: 6, kind: input, shape index: {}]   ;;  %s1756_s7 = inlined_call_operand.vmem [shape: f32[1,32], index: 7, kind: input, shape index: {}]   ;;  %s1757_s8 = inlined_call_operand.hbm [shape: bf16[2,16,32], index: 8, kind: output, shape index: {}]  }
   0x1   :  { %1767 = sst [smem:[#allocation19_spill]] %s1749_s0 }
   0x2   :  { %1768 = sst [smem:[#allocation20_spill]] %s1751_s2 }
   0x3   :  { %1769 = sst [smem:[#allocation21_spill]] %s1753_s4 }
   0x4   :  { %13 = vsyncpa [#allocation3], 0 }
   0x5   :  { %15 = vsyncpa [#allocation3 + $0x1], 0 }
   0x6   :  { %16 = vsyncpa [#allocation6], 0 }
   0x7   :  { %18 = vsyncpa [#allocation6 + $0x1], 0 }
   0x8   :  { %19 = vsyncpa [#allocation9], 0 }
   0x9   :  { %20 = vsyncpa [#allocation4], 0 }
   0xa   :  { %22 = vsyncpa [#allocation4 + $0x1], 0  ;;  %s1428_s27 = smov 0   ;;  %s1430_s28 = smov 0  }
   0xb   :  { %s1432_s29 = smov 0   ;;  %s1434_s30 = smov 0  }
   0xc LB: > { %1770 = sst [smem:[#allocation16_spill]] %s1358_s29  ;;  %s1449_s9 = sadd.s32 4294967295, %s1362_s30   ;;  %s1362_s30 = sphi %s1434_s30, %s1795_s30   ;;  %s1358_s29 = sphi %s1432_s29, %s1797_s29   ;;  %s1354_s28 = sphi %s1430_s28, %s1799_s28   ;;  %s1350_s27 = sphi %s1428_s27, %s1798_s27  }
   0xd   : > { %s964_s10 = sadd.s32 4294967294, %s1362_s30   ;;  %p48_p0 = scmp.ne.s32.totalorder %s1354_s28, %s1350_s27 }
   0xe   : > { %p1758_p1 = scmp.eq.s32.totalorder %s1449_s9, 0  ;;  %p230_p3 = scmp.eq.s32.totalorder %s964_s10, 1 }
   0xf   : > { %p965_p5 = scmp.ge.s32.totalorder %s1362_s30, 1  ;;  %p237_p7 = scmp.lt.s32.totalorder %s1362_s30, 3 }
  0x10   : > { %p1458_p4 = por %p1758_p1, %p48_p0  ;;  %p1463_p6 = por %p230_p3, %p48_p0 }
  0x11   : > { %p1468_p8 = pnand %p965_p5, %p237_p7  ;;  %s1364_s14 = smov [#allocation7]  }
  0x12   : > { %s1771_s11 = scalar_select %p1458_p4, 1, 0 }
  0x13   : > { %s1772_s12 = scalar_select %p1463_p6, 1, 0 }
  0x14   : > { %s1773_s13 = scalar_select %p1468_p8, 1, 0 }
  0x15   : > { %s249_s15 = sshll.u32 %s1364_s14, 4  ;;  %p1064_p9 = pneg %p1468_p8  ;;  %s1472_s15 = int_to_ptr.vmem [resolvable:$true] %s249_s15 }
  0x16   : > { %s1365_s17 = smov [#allocation8]   ;;  %s1775_s2 = sld [smem:[#allocation20_spill]] }
  0x17   : > { %p1479_p11 = pnand %p1064_p9, %p1758_p1  ;;  %s265_s18 = sshll.u32 %s1365_s17, 4  ;;  %s1483_s18 = int_to_ptr.vmem [resolvable:$true] %s265_s18 }
  0x19   : > { %p1170_p13 = pneg %p1479_p11 }
  0x1c   : > { %s1168_s21 = scalar_lea.hbm %s1775_s2, 256 }
  0x1d   : > { %p1169_p12 = scmp.ne.s32.totalorder %s1775_s2, %s1168_s21  ;;  %p1175_p5 = scmp.lt.u32.totalorder %s1168_s21, %s1775_s2 }
  0x1f   : > { %p1171_p0 = pnand %p1170_p13, %p1169_p12 }
  0x21   : > { %p1172_p3 = pneg %p1171_p0 }
  0x23   : > { %p1177_p7 = pnand %p1175_p5, %p1172_p3 }
  0x25   : > { %1180 = shalt.err (!%p1177_p7)
}
  0x26   : > { %s1181_s26 = scalar_lea.vmem %s1472_s15, 256  ;;  %p1189_p2 = scmp.lt.s32.totalorder %s1472_s15, %s1472_s15 }
  0x27   : > { %p1182_p9 = scmp.ne.s32.totalorder %s1472_s15, %s1181_s26  ;;  %p1190_p12 = scmp.lt.s32.totalorder %s1181_s26, %s1181_s26 }
  0x29   : > { %p1184_p10 = pnand %p1182_p9, %p1170_p13  ;;  %p1191_p0 = por %p1190_p12, %p1189_p2 }
  0x2b   : > { %p1185_p1 = pneg %p1184_p10 }
  0x2d   : > { %p1192_p6 = pnand %p1191_p0, %p1185_p1 }
  0x2f   : > { %1195 = shalt.err (!%p1192_p6)
}
  0x30   : > { %s1759_s10 = smov 64   ;;  %s1760_s14 = smov 4  }
  0x31   : > { %1067 = dma.hbm_to_vmem [thread:$0]  (!%p1479_p11), %s1775_s2, 256, %s1472_s15, [#allocation6], %s1759_s10, %s1759_s10, %s1760_s14  }
  0x32   : > { %s1776_s4 = sld [smem:[#allocation21_spill]] }
  0x38   : > { %s1196_s22 = scalar_lea.hbm %s1776_s4, 256 }
  0x39   : > { %p1197_p1 = scmp.ne.s32.totalorder %s1776_s4, %s1196_s22  ;;  %p1203_p10 = scmp.lt.u32.totalorder %s1196_s22, %s1776_s4 }
  0x3b   : > { %p1199_p2 = pnand %p1197_p1, %p1170_p13 }
  0x3d   : > { %p1200_p6 = pneg %p1199_p2 }
  0x3f   : > { %p1205_p3 = pnand %p1203_p10, %p1200_p6 }
  0x41   : > { %1208 = shalt.err (!%p1205_p3)
}
  0x42   : > { %s1209_s15 = scalar_lea.vmem %s1483_s18, 256  ;;  %p1217_p12 = scmp.lt.s32.totalorder %s1483_s18, %s1483_s18 }
  0x43   : > { %p1210_p5 = scmp.ne.s32.totalorder %s1483_s18, %s1209_s15  ;;  %p1218_p0 = scmp.lt.s32.totalorder %s1209_s15, %s1209_s15 }
  0x45   : > { %p1212_p7 = pnand %p1210_p5, %p1170_p13  ;;  %p1219_p1 = por %p1218_p0, %p1217_p12 }
  0x47   : > { %p1213_p9 = pneg %p1212_p7 }
  0x49   : > { %p1220_p2 = pnand %p1219_p1, %p1213_p9 }
  0x4b   : > { %1223 = shalt.err (!%p1220_p2)
}
  0x4c   : > { %1070 = dma.hbm_to_vmem [thread:$0]  (!%p1479_p11), %s1776_s4, 256, %s1483_s18, [#allocation9], %s1759_s10, %s1759_s10, %s1760_s14  }
  0x4d   : > { %s1544_s16 = sadd.s32 1, %s1362_s30   ;;  %s35_s20 = sadd.s32 1, %s1358_s29 }
  0x4e   : > { %1777 = sst [smem:[#allocation17_spill]] %s1544_s16  ;;  %s32_s21 = ssub.s32 %s1362_s30, %s1544_s16 }
  0x4f   : > { %p42_p13 = scmp.ne.s32.totalorder %s1358_s29, %s1354_s28  ;;  %p33_p6 = scmp.eq.s32.totalorder %s32_s21, 0 }
  0x50   : > { %p43_p10 = scmp.eq.s32.totalorder %s1362_s30, 0  ;;  %p1778_p3 = scmp.eq.s32.totalorder %s1449_s9, 1 }
  0x51   : > { %p1084_p7 = scmp.lt.s32.totalorder %s1362_s30, 2  ;;  %s1563_s24 = sand.u32 1, %s1358_s29  }
  0x52   : > { %p1554_p5 = por %p1778_p3, %p42_p13  ;;  %p44_p9 = por %p43_p10, %p42_p13 }
  0x53   : > { %s1560_s23 = scalar_select %p33_p6, %s1358_s29, %s35_s20  }
  0x54   : > { %s1779_s22 = scalar_select %p1554_p5, 1, 0 }
  0x55   : > { %1780 = sst [smem:[#allocation18_spill]] %s1560_s23  ;;  %s969_s18 = sshll.u32 %s1563_s24, 3 }
  0x56   : > { %s1005_s25 = sshll.u32 %s1362_s30, 7  ;;  %s1781_s0 = sld [smem:[#allocation19_spill]] }
  0x57   : > { %s292_s19 = scalar_lea.vmem [#allocation2], %s969_s18  ;;  %p1574_p11 = pnand %p1084_p7, %p44_p9 }
  0x58   : > { %s299_s20 = sshll.u32 %s292_s19, 4  ;;  %s972_s14 = sshll.u32 %s1563_s24, 2  ;;  %s1572_s20 = int_to_ptr.vmem [resolvable:$true] %s299_s20 }
  0x59   : > { %s289_s2 = scalar_lea.sflag [#allocation3], %s1563_s24  ;;  %p1226_p0 = pneg %p1574_p11 }
  0x5c   : > { %s1570_s17 = scalar_lea.hbm %s1781_s0, %s1005_s25  ;;  %s1229_s15 = scalar_lea.hbm %s1781_s0, 256 }
  0x5d   : > { %s1224_s26 = scalar_lea.hbm %s1570_s17, 128  ;;  %p1230_p13 = scmp.lt.u32.totalorder %s1570_s17, %s1781_s0 }
  0x5e   : > { %p1225_p12 = scmp.ne.s32.totalorder %s1570_s17, %s1224_s26  ;;  %p1231_p6 = scmp.lt.u32.totalorder %s1229_s15, %s1224_s26 }
  0x5f   : > { %p1233_p3 = scmp.lt.u32.totalorder %s1224_s26, %s1570_s17 }
  0x60   : > { %p1227_p1 = pnand %p1226_p0, %p1225_p12  ;;  %p1232_p10 = por %p1231_p6, %p1230_p13 }
  0x62   : > { %p1228_p2 = pneg %p1227_p1  ;;  %p1234_p7 = por %p1233_p3, %p1232_p10 }
  0x64   : > { %p1235_p9 = pnand %p1234_p7, %p1228_p2 }
  0x66   : > { %1238 = shalt.err (!%p1235_p9)
}
  0x67   : > { %s1239_s10 = scalar_lea.vmem %s1572_s20, 128  ;;  %s1368_s18 = smov [#allocation2]  }
  0x68   : > { %p1240_p12 = scmp.ne.s32.totalorder %s1572_s20, %s1239_s10  ;;  %s1244_s25 = sshll.u32 %s1368_s18, 4  ;;  %s1245_s25 = int_to_ptr.vmem [resolvable:$false] %s1244_s25 }
  0x69   : > { %s1246_s4 = scalar_lea.vmem %s1245_s25, 256  ;;  %p1247_p4 = scmp.lt.s32.totalorder %s1572_s20, %s1245_s25 }
  0x6a   : > { %p1242_p1 = pnand %p1240_p12, %p1226_p0  ;;  %p1248_p13 = scmp.lt.s32.totalorder %s1246_s4, %s1239_s10 }
  0x6c   : > { %p1243_p5 = pneg %p1242_p1  ;;  %p1249_p6 = por %p1248_p13, %p1247_p4 }
  0x6e   : > { %p1250_p10 = pnand %p1249_p6, %p1243_p5 }
  0x70   : > { %1253 = shalt.err (!%p1250_p10)
}
  0x71   : > { %s1783_s26 = smov 4   ;;  %s1784_s15 = smov 64  }
  0x72   : > { %1074 = dma.hbm_to_vmem [thread:$0]  (!%p1574_p11), %s1570_s17, 128, %s1572_s20, %s289_s2, %s1784_s15, %s1784_s15, %s1783_s26  }
  0x73   : > { %s973_s19 = sshll.u32 %s1362_s30, 6  ;;  %s313_s4 = scalar_lea.vmem [#allocation5], %s972_s14 }
  0x74   : > { %s1615_s25 = scalar_lea.hbm %s1750_s1, %s973_s19  ;;  %s320_s0 = sshll.u32 %s313_s4, 4  ;;  %s321_s0 = int_to_ptr.vmem [resolvable:$true] %s320_s0 }
  0x75   : > { %s1785_s23 = sand.u32 1, %s1362_s30   ;;  %s1254_s16 = scalar_lea.hbm %s1615_s25, 64 }
  0x76   : > { %s310_s29 = scalar_lea.sflag [#allocation6], %s1785_s23  ;;  %p1255_p4 = scmp.ne.s32.totalorder %s1615_s25, %s1254_s16 }
  0x77   : > { %s1259_s20 = scalar_lea.hbm %s1750_s1, 128  ;;  %p1260_p3 = scmp.lt.u32.totalorder %s1615_s25, %s1750_s1 }
  0x78   : > { %p1257_p5 = pnand %p1255_p4, %p1226_p0  ;;  %p1261_p7 = scmp.lt.u32.totalorder %s1259_s20, %s1254_s16 }
  0x79   : > { %p1263_p12 = scmp.lt.u32.totalorder %s1254_s16, %s1615_s25 }
  0x7a   : > { %p1258_p2 = pneg %p1257_p5  ;;  %p1262_p9 = por %p1261_p7, %p1260_p3 }
  0x7c   : > { %p1264_p1 = por %p1263_p12, %p1262_p9 }
  0x7e   : > { %p1265_p13 = pnand %p1264_p1, %p1258_p2 }
  0x80   : > { %1268 = shalt.err (!%p1265_p13)
}
  0x81   : > { %s1269_s14 = scalar_lea.vmem %s321_s0, 64  ;;  %s1369_s23 = smov [#allocation5]  }
  0x82   : > { %p1270_p6 = scmp.ne.s32.totalorder %s321_s0, %s1269_s14  ;;  %s1274_s15 = sshll.u32 %s1369_s23, 4  ;;  %s1275_s15 = int_to_ptr.vmem [resolvable:$false] %s1274_s15 }
  0x83   : > { %s1276_s19 = scalar_lea.vmem %s1275_s15, 128  ;;  %p1277_p5 = scmp.lt.s32.totalorder %s321_s0, %s1275_s15 }
  0x84   : > { %p1272_p10 = pnand %p1270_p6, %p1226_p0  ;;  %p1278_p8 = scmp.lt.s32.totalorder %s1276_s19, %s1269_s14 }
  0x86   : > { %p1273_p4 = pneg %p1272_p10  ;;  %p1279_p3 = por %p1278_p8, %p1277_p5 }
  0x88   : > { %p1280_p7 = pnand %p1279_p3, %p1273_p4 }
  0x8a   : > { %1283 = shalt.err (!%p1280_p7)
}
  0x8b   : > { %1077 = dma.hbm_to_vmem [thread:$0]  (!%p1574_p11), %s1615_s25, 64, %s321_s0, %s310_s29  }
  0x8c   : > { %p1786_p2 = scmp.ne.s32.totalorder %s1773_s13, 0 }
  0x8d   : > { %s1643_s16 = sand.u32 (!%p1786_p2), 1, %s1354_s28   ;;  %p1787_p8 = scmp.ne.s32.totalorder (!%p1786_p2), %s1771_s11, 0 }
  0x8e   : > { %329 = sbr.rel (%p1786_p2) target bundleno = 821 (0x335), region = 52  ;;  %s975_s18 = sshll.u32 (!%p1786_p2), %s1643_s16, 3 }
  0x8f   : > { %s332_s10 = scalar_lea.sflag (!%p1786_p2), [#allocation3], %s1643_s16  ;;  %s335_s4 = scalar_lea.vmem (!%p1786_p2), [#allocation2], %s975_s18 }
  0x95   : > { %1329 = dma.done.wait (%p1787_p8), %s332_s10, 128  }
  0x96   : > { %1331 = vsyncadd (%p1787_p8), %s332_s10, 4294967168  ;;  %s340_s0 = sand.u32 1, %s1449_s9   ;;  %s976_s29 = sshll.u32 %s1643_s16, 2 }
  0x97   : > { %s341_s13 = scalar_lea.sflag [#allocation6], %s340_s0  ;;  %s344_s21 = scalar_lea.vmem [#allocation5], %s976_s29 }
  0x98   : > { %1333 = dma.done.wait (%p1787_p8), %s341_s13, 64  }
  0x99   : > { %1335 = vsyncadd (%p1787_p8), %s341_s13, 4294967232  ;;  %p1788_p11 = scmp.eq.s32.totalorder %s1449_s9, 0 }
  0x9b   : > { %1337 = dma.done.wait (%p1788_p11), [#allocation6], 256   ;;  %p1789_p0 = pmov %p1788_p11 }
  0x9d   : > { %1339 = vsyncadd (%p1789_p0), [#allocation6], 4294967040  ;;  %p1790_p9 = pmov %p1789_p0 }
  0x9e   : > { %p1791_p12 = pmov %p1789_p0 }
  0x9f   : > { %1341 = dma.done.wait (%p1790_p9), [#allocation9], 256  }
  0xa0   : > { %1343 = vsyncadd (%p1791_p12), [#allocation9], 4294967040  ;;  %v1370_v0 = vmov 0.0   ;;  %vm1371_vm0 = vmmov 0   ;;  %v1152_v1 = vld [vmem:[#allocation8] sm:$0xff]   ;;  %v1153_v2 = vld [vmem:[#allocation7] sm:$0xff]   ;;  %v702_v47 = vlaneseq }
  0xa1   : > { %1029 = vmatprep.subr.bf16.mxu1 %v1370_v0  ;;  %1021 = vmatprep.subr.bf16.mxu0 %v1370_v0  ;;  %v1154_v3 = vld [vmem:[#allocation8 + $0x8] sm:$0xff]   ;;  %v1155_v4 = vld [vmem:[#allocation7 + $0x8] sm:$0xff]   ;;  %vm422_vm1 = vcmask 261120   ;;  %v1158_v8 = vld [vmem:[%s1755_s6 + $0x8] sm:$0xff]   ;;  %v1372_v22 = vmov 1   ;;  %v1373_v23 = vmov 0  }
  0xa2   : > { %1033 = vmatprep.mubr.msk.bf16.mxu1 %vm1371_vm0, %v1370_v0  ;;  %1025 = vmatprep.mubr.msk.bf16.mxu0 %vm1371_vm0, %v1370_v0  ;;  %v1669_v5 = vld [vmem:[%s335_s4] sm:$0xff]   ;;  %v393_v6 = vld [vmem:[%s344_s21] sm:$0xf]  ;;  %v1374_v37 = vmov 2   ;;  %v1375_v38 = vmov 3   ;;  %v1376_v40 = vmov 4  }
  0xa3   : > { %1030 = vmatpush3.bf16.msra.mxu1 %v1152_v1  ;;  %1022 = vmatpush3.bf16.msra.mxu0 %v1153_v2  ;;  %v1157_v7 = vld [vmem:[%s1755_s6] sm:$0xff]   ;;  %v1377_v41 = vmov 5   ;;  %v1378_v42 = vmov 6   ;;  %v1379_v43 = vmov 7   ;;  %v703_v50 = vshrl.u32 %v702_v47, 7  ;;  %s1008_s19 = sshll.u32 %s1449_s9, 7 }
  0xa4   : > { %1031 = vmatprep.subr.bf16.mxu1 %v1370_v0  ;;  %1023 = vmatprep.subr.bf16.mxu0 %v1370_v0  ;;  %v985_v9 = vld [vmem:[%s1754_s5] ss:$0 sm:$0xff]  ;;  %v821_v47 = vunpack.c.h.bf16 %v1669_v5  ;;  %vm832_vm2 = vcmask 257024   ;;  %s389_s10 = scalar_lea.vmem [#allocation10], %s975_s18  ;;  %s1703_s13 = scalar_lea.hbm %s1757_s8, %s1008_s19 }
  0xa5   : > { %v980_v10 = vld [vmem:[%s1752_s3] ss:$0 sm:$0xff]  ;;  %1137 = vset.pattern.permute.xlu1 %v1372_v22  ;;  %1136 = vset.pattern.permute.xlu0 %v1373_v23  ;;  %v718_v53 = vsub.s32 1, %v703_v50  ;;  %v704_v54 = vsub.s32 0, %v703_v50  ;;  %v734_v59 = vsub.s32 2, %v703_v50  ;;  %v750_v61 = vsub.s32 3, %v703_v50 }
  0xa6   : > { %v989_v51 = vld [vmem:[%s1756_s7] ss:$0 sm:$0xff]  ;;  %s849_s4 = sshll.u32 %s389_s10, 4  ;;  %s836_s21 = scalar_lea.sflag [#allocation4], %s1643_s16  ;;  %s1705_s4 = int_to_ptr.vmem [resolvable:$true] %s849_s4 }
  0xa7   : > { %1032 = vmatpush3.bf16.msra.mxu1 %v1154_v3  ;;  %1024 = vmatpush3.bf16.msra.mxu0 %v1155_v4  ;;  %v766_v4 = vsub.s32 4, %v703_v50  ;;  %s1284_s11 = scalar_lea.vmem %s1705_s4, 128  ;;  %p1792_p13 = scmp.ne.s32.totalorder %s1779_s22, 0 }
  0xa8   : > { %1037 = vmatprep.subr.bf16.mxu0 %v1370_v0  ;;  %p1285_p1 = scmp.ne.s32.totalorder %s1705_s4, %s1284_s11  ;;  %s1380_s9 = smov [#allocation10]  }
  0xa9   : > { %s1288_s18 = sshll.u32 %s1380_s9, 4  ;;  %s1289_s18 = int_to_ptr.vmem [resolvable:$false] %s1288_s18 }
  0xaa   : > { %1034 = vmatmul.mubr.msk.bf16.vlgmr.msra.gmra.mrb[0].mxu1 %vm422_vm1, %v393_v6  ;;  %1026 = vmatmul.mubr.msk.bf16.vlgmr.msra.gmra.mrb[0].mxu0 %vm422_vm1, %v1669_v5  ;;  %p1286_p6 = pnand %p1285_p1, %p1792_p13  ;;  %s1290_s25 = scalar_lea.vmem %s1289_s18, 256 }
  0xab   : > { %1041 = vmatprep.mubr.msk.bf16.mxu0 %vm1371_vm0, %v1370_v0  ;;  %1038 = vmatpush3.bf16.msra.mxu0 %v1157_v7  ;;  %p1291_p4 = scmp.lt.s32.totalorder %s1705_s4, %s1289_s18  ;;  %p1292_p5 = scmp.lt.s32.totalorder %s1290_s25, %s1284_s11 }
  0xac   : > { %1039 = vmatprep.subr.bf16.mxu0 %v1370_v0  ;;  %p1287_p10 = pneg %p1286_p6 }
  0xad   : > { %p1293_p3 = por %p1292_p5, %p1291_p4 }
  0xaf   : > { %1040 = vmatpush3.bf16.msra.mxu0 %v1158_v8  ;;  %p1294_p7 = pnand %p1293_p3, %p1287_p10 }
  0xb2   : > { %1042 = vmatmul.mubr.msk.bf16.vlgmr.msra.gmra.mrb[4].mxu0 %vm422_vm1, %v393_v6 }
 0x17d   : > { %v527_v11 = vpop.f32.mrb[0].mxu1  ;;  %v460_v14 = vpop.f32.mrb[0].mxu0 }
 0x17e   : > { %v528_v12 = vadd.f32 %v985_v9, %v527_v11  ;;  %v1035_v13 = vpop.f32.mrb[1].mxu1  ;;  %v461_v15 = vadd.f32 %v980_v10, %v460_v14  ;;  %v1027_v17 = vpop.f32.mrb[1].mxu0  ;;  %v782_v14 = vsub.s32 5, %v703_v50 }
 0x17f   : > { %v530_v16 = vpop.f32.mrb[2].mxu1  ;;  %v463_v19 = vpop.f32.mrb[2].mxu0 }
 0x180   : > { %v1036_v18 = vpop.f32.mrb[3].mxu1  ;;  %1045 = vmatprep.subr.msk.mxu1 %vm422_vm1, %v528_v12  ;;  %1047 = vmatprep.mubr.msk.f32.mxu1 %vm422_vm1, %v461_v15  ;;  %v1028_v20 = vpop.f32.mrb[3].mxu0  ;;  %v464_v21 = vadd.f32 %v980_v10, %v463_v19 }
 0x181   : > { %1046 = vmatpush3.xpose.msk.msra.mxu1 %vm422_vm1, %v528_v12  ;;  %v798_v18 = vsub.s32 6, %v703_v50 }
 0x184   : > { %1048 = vmatmul.mubr.msk.f32.vlgmr.msra.gmra.mrb[4].mxu1 %vm422_vm1, %v464_v21 }
 0x185   : > { %v590_v24 = vpop.f32.mrb[4].mxu0 }
 0x186   : > { %v1043_v25 = vpop.f32.mrb[5].mxu0  ;;  %v591_v52 = vadd.f32 %v989_v51, %v590_v24 }
 0x187   : > { %v593_v26 = vpop.f32.mrb[6].mxu0 }
 0x188   : > { %v1044_v27 = vpop.f32.mrb[7].mxu0  ;;  %v719_v57 = vrot.slane %v591_v52, %v718_v53  ;;  %v705_v58 = vrot.slane %v591_v52, %v704_v54  ;;  %v735_v1 = vrot.slane %v591_v52, %v734_v59  ;;  %v751_v3 = vrot.slane %v591_v52, %v750_v61 }
 0x189   : > { %v767_v13 = vrot.slane %v591_v52, %v766_v4  ;;  %v799_v26 = vrot.slane %v591_v52, %v798_v18 }
 0x257   : > { %v1049_v28 = vpop.f32.mrb[4].mxu1 }
 0x258   : > { %v997_v29 = vmul.f32 -1.442695, %v1049_v28  ;;  %v671_v30 = vpop.f32.mrb[5].mxu1  ;;  %v814_v28 = vsub.s32 7, %v703_v50 }
 0x259   : > { %v996_v31 = vmul.f32 -1.442695, %v671_v30 }
 0x25a   : > { %1160 = vpow2.f32 %v997_v29 }
 0x25b   : > { %1162 = vpow2.f32 %v996_v31 }
 0x264   : > { %v1161_v32 = vpop.eup %1160 }
 0x265   : > { %v687_v33 = vadd.f32 1.0, %v1161_v32  ;;  %v1163_v34 = vpop.eup %1162 }
 0x266   : > { %v686_v35 = vadd.f32 1.0, %v1163_v34 }
 0x267   : > { %1164 = vrcp.f32 %v687_v33 }
 0x268   : > { %1166 = vrcp.f32 %v686_v35  ;;  %v815_v35 = vrot.slane %v591_v52, %v814_v28 }
 0x271   : > { %v1165_v36 = vpop.eup %1164 }
 0x272   : > { %713 = vperm.xlu1 %1137, %v1165_v36   ;;  %699 = vperm.xlu0 %1136, %v1165_v36   ;;  %v1167_v39 = vpop.eup %1166 }
 0x276   : > { %1138 = vset.pattern.permute.xlu1 %v1374_v37  ;;  %1139 = vset.pattern.permute.xlu0 %v1375_v38 }
 0x277   : > { %729 = vperm.xlu1 %1138, %v1165_v36   ;;  %745 = vperm.xlu0 %1139, %v1165_v36  }
 0x27b   : > { %1140 = vset.pattern.permute.xlu1 %v1376_v40  ;;  %1142 = vset.pattern.permute.xlu0 %v1373_v23 }
 0x27c   : > { %761 = vperm.xlu1 %1140, %v1165_v36   ;;  %694 = vperm.xlu0 %1142, %v1167_v39  }
 0x280   : > { %1141 = vset.pattern.permute.xlu1 %v1377_v41  ;;  %1144 = vset.pattern.permute.xlu0 %v1374_v37 }
 0x281   : > { %777 = vperm.xlu1 %1141, %v1165_v36   ;;  %725 = vperm.xlu0 %1144, %v1167_v39  }
 0x285   : > { %1143 = vset.pattern.permute.xlu1 %v1372_v22  ;;  %1147 = vset.pattern.permute.xlu0 %v1377_v41  ;;  %v783_v22 = vrot.slane %v591_v52, %v782_v14 }
 0x286   : > { %709 = vperm.xlu1 %1143, %v1167_v39   ;;  %773 = vperm.xlu0 %1147, %v1167_v39  }
 0x28a   : > { %1145 = vset.pattern.permute.xlu1 %v1375_v38  ;;  %1149 = vset.pattern.permute.xlu0 %v1378_v42 }
 0x28b   : > { %741 = vperm.xlu1 %1145, %v1167_v39   ;;  %793 = vperm.xlu0 %1149, %v1165_v36  }
 0x28f   : > { %1146 = vset.pattern.permute.xlu1 %v1376_v40  ;;  %1151 = vset.pattern.permute.xlu0 %v1379_v43 }
 0x290   : > { %757 = vperm.xlu1 %1146, %v1167_v39  }
 0x294   : > { %1148 = vset.pattern.permute.xlu1 %v1378_v42 }
 0x295   : > { %789 = vperm.xlu1 %1148, %v1167_v39  }
 0x299   : > { %1150 = vset.pattern.permute.xlu1 %v1379_v43 }
 0x29a   : > { %805 = vperm.xlu1 %1150, %v1167_v39  }
 0x29e   : > { %809 = vperm.xlu1 %1150, %v1165_v36   ;;  %v820_v36 = vunpack.c.l.bf16 %v1669_v5 }
 0x2f1   : > { %v714_v44 = vpop.permute.xlu1 %713  ;;  %v700_v45 = vpop.permute.xlu0 %699 }
 0x2f2   : > { %v721_v8 = vmul.f32 %v719_v57, %v714_v44  ;;  %v707_v9 = vmul.f32 %v705_v58, %v700_v45 }
 0x2f4   : > { %v723_v16 = vadd.f32 %v721_v8, %v707_v9 }
 0x2f6   : > { %v730_v46 = vpop.permute.xlu1 %729  ;;  %v746_v48 = vpop.permute.xlu0 %745 }
 0x2f7   : > { %v737_v12 = vmul.f32 %v735_v1, %v730_v46  ;;  %v753_v24 = vmul.f32 %v751_v3, %v746_v48 }
 0x2f9   : > { %v739_v21 = vadd.f32 %v737_v12, %v723_v16 }
 0x2fb   : > { %v762_v49 = vpop.permute.xlu1 %761  ;;  %v695_v56 = vpop.permute.xlu0 %694  ;;  %v755_v29 = vadd.f32 %v753_v24, %v739_v21 }
 0x2fc   : > { %v706_v62 = vmul.f32 %v705_v58, %v695_v56  ;;  %v769_v30 = vmul.f32 %v767_v13, %v762_v49 }
 0x2fe   : > { %v771_v38 = vadd.f32 %v769_v30, %v755_v29 }
 0x300   : > { %v778_v55 = vpop.permute.xlu1 %777  ;;  %v726_v0 = vpop.permute.xlu0 %725 }
 0x301   : > { %v736_v6 = vmul.f32 %v735_v1, %v726_v0  ;;  %v785_v34 = vmul.f32 %v783_v22, %v778_v55 }
 0x303   : > { %v787_v42 = vadd.f32 %v785_v34, %v771_v38 }
 0x305   : > { %v710_v60 = vpop.permute.xlu1 %709  ;;  %v774_v20 = vpop.permute.xlu0 %773 }
 0x306   : > { %v720_v63 = vmul.f32 %v719_v57, %v710_v60  ;;  %v784_v25 = vmul.f32 %v783_v22, %v774_v20 }
 0x308   : > { %v722_v2 = vadd.f32 %v720_v63, %v706_v62 }
 0x30a   : > { %v742_v7 = vpop.permute.xlu1 %741  ;;  %v738_v10 = vadd.f32 %v736_v6, %v722_v2  ;;  %v794_v33 = vpop.permute.xlu0 %793 }
 0x30b   : > { %v752_v11 = vmul.f32 %v751_v3, %v742_v7  ;;  %v801_v39 = vmul.f32 %v799_v26, %v794_v33 }
 0x30d   : > { %v754_v17 = vadd.f32 %v752_v11, %v738_v10  ;;  %v803_v45 = vadd.f32 %v801_v39, %v787_v42 }
 0x30f   : > { %v758_v15 = vpop.permute.xlu1 %757 }
 0x310   : > { %v768_v19 = vmul.f32 %v767_v13, %v758_v15 }
 0x312   : > { %v770_v23 = vadd.f32 %v768_v19, %v754_v17 }
 0x314   : > { %v790_v27 = vpop.permute.xlu1 %789  ;;  %v786_v31 = vadd.f32 %v784_v25, %v770_v23 }
 0x315   : > { %v800_v32 = vmul.f32 %v799_v26, %v790_v27 }
 0x317   : > { %v802_v40 = vadd.f32 %v800_v32, %v786_v31 }
 0x319   : > { %v806_v37 = vpop.permute.xlu1 %805 }
 0x31a   : > { %v816_v41 = vmul.f32 %v815_v35, %v806_v37 }
 0x31c   : > { %v818_v43 = vadd.f32 %v816_v41, %v802_v40 }
 0x31d   : > { %v810_v44 = vpop.permute.xlu1 %809 }
 0x31e   : > { %v822_v46 = vadd.f32 %v820_v36, %v818_v43  ;;  %v817_v48 = vmul.f32 %v815_v35, %v810_v44 }
 0x320   : > { %v1006_v49 = vpack.c.bf16 %v822_v46, %v822_v46  ;;  %v819_v50 = vadd.f32 %v817_v48, %v803_v45 }
 0x322   : > { %833 = vst.msk [vmem:[%s389_s10] sm:$0xf] %vm832_vm2, %v1006_v49  ;;  %v823_v51 = vadd.f32 %v821_v47, %v819_v50 }
 0x324   : > { %v1007_v5 = vpack.c.bf16 %v823_v51, %v823_v51 }
 0x326   : > { %834 = vst.msk [vmem:[%s389_s10 + $0x4] sm:$0xf] %vm832_vm2, %v1007_v5 }
 0x327   : > { %1297 = shalt.err (!%p1294_p7)
}
 0x328   : > { %s1298_s2 = scalar_lea.hbm %s1703_s13, 128  ;;  %s1302_s24 = scalar_lea.hbm %s1757_s8, 256 }
 0x329   : > { %p1299_p2 = scmp.ne.s32.totalorder %s1703_s13, %s1298_s2  ;;  %p1303_p0 = scmp.lt.u32.totalorder %s1703_s13, %s1757_s8 }
 0x32a   : > { %p1304_p9 = scmp.lt.u32.totalorder %s1302_s24, %s1298_s2  ;;  %p1306_p1 = scmp.lt.u32.totalorder %s1298_s2, %s1703_s13 }
 0x32b   : > { %p1300_p8 = pnand %p1299_p2, %p1792_p13 }
 0x32c   : > { %p1305_p12 = por %p1304_p9, %p1303_p0 }
 0x32d   : > { %p1301_p11 = pneg %p1300_p8 }
 0x32e   : > { %p1307_p6 = por %p1306_p1, %p1305_p12 }
 0x330   : > { %p1308_p10 = pnand %p1307_p6, %p1301_p11 }
 0x332   : > { %1311 = shalt.err (!%p1308_p10)
}
 0x333   : > { %s1381_s23 = smov 64   ;;  %s1382_s15 = smov 4  }
 0x334   : > { %1062 = dma.vmem_to_hbm [thread:$0]  (%p1792_p13), %s1705_s4, 128, %s1703_s13, %s836_s21, %s1381_s23, %s1381_s23, %s1382_s15  }
 0x335 PF: > { %s864_s19 = sand.u32 1, %s1350_s27   ;;  %p1793_p4 = scmp.ne.s32.totalorder %s1772_s12, 0 }
 0x336   : > { %p1794_p5 = scmp.ge.s32.totalorder %s1362_s30, 2  ;;  %s865_s10 = scalar_lea.sflag [#allocation4], %s864_s19 }
 0x338   : > { %p1079_p3 = pnand %p1794_p5, %p1793_p4 }
 0x33a   : > { %1345 = dma.done.wait (!%p1079_p3), %s865_s10, 128  }
 0x33b   : > { %1347 = vsyncadd (!%p1079_p3), %s865_s10, 4294967168  ;;  %s1795_s30 = sld [smem:[#allocation17_spill]]  ;;  %s1796_s0 = sld [smem:[#allocation16_spill]] }
 0x33c   : > { %s1797_s29 = sld [smem:[#allocation18_spill]]  ;;  %s1798_s27 = smov %s1354_s28 }
 0x341   : > { %p25_p7 = scmp.ge.s32.totalorder %s1795_s30, 4   ;;  %s1799_s28 = smov %s1796_s0 }
 0x343   :  { %27 = sbr.rel (!%p25_p7) target bundleno = 12 (0xc), region = 118 }
 0x34a   :  { %870 = vsyncpa [#allocation3], 1 }
 0x34b   :  { %872 = vsyncpa [#allocation3 + $0x1], 1 }
 0x34c   :  { %873 = vsyncpa [#allocation6], 1 }
 0x34d   :  { %875 = vsyncpa [#allocation6 + $0x1], 1 }
 0x34e   :  { %876 = vsyncpa [#allocation9], 1 }
 0x34f   :  { %877 = vsyncpa [#allocation4], 1 }
 0x350   :  { %879 = vsyncpa [#allocation4 + $0x1], 1 }

// kernel: tpu_custom_call.1
= control target key start
LH: loop header
LB: loop body
LE: loop exit
PB: predicated region body
PF: predicated region fallthrough
CT: control target
= control target key end

     0   :  { %s1749_s0 = inlined_call_operand.hbm [shape: bf16[2,16,32], index: 0, kind: input, shape index: {}]   ;;  %s1750_s1 = inlined_call_operand.hbm [shape: bf16[2,8,32], index: 1, kind: input, shape index: {}]   ;;  %s1751_s2 = inlined_call_operand.hbm [shape: bf16[32,32], index: 2, kind: input, shape index: {}]   ;;  %s1752_s3 = inlined_call_operand.vmem [shape: f32[1,32], index: 3, kind: input, shape index: {}]   ;;  %s1753_s4 = inlined_call_operand.hbm [shape: bf16[32,32], index: 4, kind: input, shape index: {}]   ;;  %s1754_s5 = inlined_call_operand.vmem [shape: f32[1,32], index: 5, kind: input, shape index: {}]   ;;  %s1755_s6 = inlined_call_operand.vmem [shape: bf16[32,32], index: 6, kind: input, shape index: {}]   ;;  %s1756_s7 = inlined_call_operand.vmem [shape: f32[1,32], index: 7, kind: input, shape index: {}]   ;;  %s1757_s8 = inlined_call_operand.hbm [shape: bf16[2,16,32], index: 8, kind: output, shape index: {}]  }
   0x1   :  { %1767 = sst [smem:[#allocation19_spill]] %s1749_s0 }
   0x2   :  { %1768 = sst [smem:[#allocation20_spill]] %s1751_s2 }
   0x3   :  { %1769 = sst [smem:[#allocation21_spill]] %s1753_s4 }
   0x4   :  { %13 = vsyncpa [#allocation3], 0 }
   0x5   :  { %15 = vsyncpa [#allocation3 + $0x1], 0 }
   0x6   :  { %16 = vsyncpa [#allocation6], 0 }
   0x7   :  { %18 = vsyncpa [#allocation6 + $0x1], 0 }
   0x8   :  { %19 = vsyncpa [#allocation9], 0 }
   0x9   :  { %20 = vsyncpa [#allocation4], 0 }
   0xa   :  { %22 = vsyncpa [#allocation4 + $0x1], 0  ;;  %s1428_s27 = smov 0   ;;  %s1430_s28 = smov 0  }
   0xb   :  { %s1432_s29 = smov 0   ;;  %s1434_s30 = smov 0  }
   0xc LB: > { %1770 = sst [smem:[#allocation16_spill]] %s1358_s29  ;;  %s1449_s9 = sadd.s32 4294967295, %s1362_s30   ;;  %s1362_s30 = sphi %s1434_s30, %s1795_s30   ;;  %s1358_s29 = sphi %s1432_s29, %s1797_s29   ;;  %s1354_s28 = sphi %s1430_s28, %s1799_s28   ;;  %s1350_s27 = sphi %s1428_s27, %s1798_s27  }
   0xd   : > { %s964_s10 = sadd.s32 4294967294, %s1362_s30   ;;  %p48_p0 = scmp.ne.s32.totalorder %s1354_s28, %s1350_s27 }
   0xe   : > { %p1758_p1 = scmp.eq.s32.totalorder %s1449_s9, 0  ;;  %p230_p3 = scmp.eq.s32.totalorder %s964_s10, 1 }
   0xf   : > { %p965_p5 = scmp.ge.s32.totalorder %s1362_s30, 1  ;;  %p237_p7 = scmp.lt.s32.totalorder %s1362_s30, 3 }
  0x10   : > { %p1458_p4 = por %p1758_p1, %p48_p0  ;;  %p1463_p6 = por %p230_p3, %p48_p0 }
  0x11   : > { %p1468_p8 = pnand %p965_p5, %p237_p7  ;;  %s1364_s14 = smov [#allocation7]  }
  0x12   : > { %s1771_s11 = scalar_select %p1458_p4, 1, 0 }
  0x13   : > { %s1772_s12 = scalar_select %p1463_p6, 1, 0 }
  0x14   : > { %s1773_s13 = scalar_select %p1468_p8, 1, 0 }
  0x15   : > { %s249_s15 = sshll.u32 %s1364_s14, 4  ;;  %p1064_p9 = pneg %p1468_p8  ;;  %s1472_s15 = int_to_ptr.vmem [resolvable:$true] %s249_s15 }
  0x16   : > { %s1365_s17 = smov [#allocation8]   ;;  %s1775_s2 = sld [smem:[#allocation20_spill]] }
  0x17   : > { %p1479_p11 = pnand %p1064_p9, %p1758_p1  ;;  %s265_s18 = sshll.u32 %s1365_s17, 4  ;;  %s1483_s18 = int_to_ptr.vmem [resolvable:$true] %s265_s18 }
  0x19   : > { %p1170_p13 = pneg %p1479_p11 }
  0x1c   : > { %s1168_s21 = scalar_lea.hbm %s1775_s2, 256 }
  0x1d   : > { %p1169_p12 = scmp.ne.s32.totalorder %s1775_s2, %s1168_s21  ;;  %p1175_p5 = scmp.lt.u32.totalorder %s1168_s21, %s1775_s2 }
  0x1f   : > { %p1171_p0 = pnand %p1170_p13, %p1169_p12 }
  0x21   : > { %p1172_p3 = pneg %p1171_p0 }
  0x23   : > { %p1177_p7 = pnand %p1175_p5, %p1172_p3 }
  0x25   : > { %1180 = shalt.err (!%p1177_p7)
}
  0x26   : > { %s1181_s26 = scalar_lea.vmem %s1472_s15, 256  ;;  %p1189_p2 = scmp.lt.s32.totalorder %s1472_s15, %s1472_s15 }
  0x27   : > { %p1182_p9 = scmp.ne.s32.totalorder %s1472_s15, %s1181_s26  ;;  %p1190_p12 = scmp.lt.s32.totalorder %s1181_s26, %s1181_s26 }
  0x29   : > { %p1184_p10 = pnand %p1182_p9, %p1170_p13  ;;  %p1191_p0 = por %p1190_p12, %p1189_p2 }
  0x2b   : > { %p1185_p1 = pneg %p1184_p10 }
  0x2d   : > { %p1192_p6 = pnand %p1191_p0, %p1185_p1 }
  0x2f   : > { %1195 = shalt.err (!%p1192_p6)
}
  0x30   : > { %s1759_s10 = smov 64   ;;  %s1760_s14 = smov 4  }
  0x31   : > { %1067 = dma.hbm_to_vmem [thread:$0]  (!%p1479_p11), %s1775_s2, 256, %s1472_s15, [#allocation6], %s1759_s10, %s1759_s10, %s1760_s14  }
  0x32   : > { %s1776_s4 = sld [smem:[#allocation21_spill]] }
  0x38   : > { %s1196_s22 = scalar_lea.hbm %s1776_s4, 256 }
  0x39   : > { %p1197_p1 = scmp.ne.s32.totalorder %s1776_s4, %s1196_s22  ;;  %p1203_p10 = scmp.lt.u32.totalorder %s1196_s22, %s1776_s4 }
  0x3b   : > { %p1199_p2 = pnand %p1197_p1, %p1170_p13 }
  0x3d   : > { %p1200_p6 = pneg %p1199_p2 }
  0x3f   : > { %p1205_p3 = pnand %p1203_p10, %p1200_p6 }
  0x41   : > { %1208 = shalt.err (!%p1205_p3)
}
  0x42   : > { %s1209_s15 = scalar_lea.vmem %s1483_s18, 256  ;;  %p1217_p12 = scmp.lt.s32.totalorder %s1483_s18, %s1483_s18 }
  0x43   : > { %p1210_p5 = scmp.ne.s32.totalorder %s1483_s18, %s1209_s15  ;;  %p1218_p0 = scmp.lt.s32.totalorder %s1209_s15, %s1209_s15 }
  0x45   : > { %p1212_p7 = pnand %p1210_p5, %p1170_p13  ;;  %p1219_p1 = por %p1218_p0, %p1217_p12 }
  0x47   : > { %p1213_p9 = pneg %p1212_p7 }
  0x49   : > { %p1220_p2 = pnand %p1219_p1, %p1213_p9 }
  0x4b   : > { %1223 = shalt.err (!%p1220_p2)
}
  0x4c   : > { %1070 = dma.hbm_to_vmem [thread:$0]  (!%p1479_p11), %s1776_s4, 256, %s1483_s18, [#allocation9], %s1759_s10, %s1759_s10, %s1760_s14  }
  0x4d   : > { %s1544_s16 = sadd.s32 1, %s1362_s30   ;;  %s35_s20 = sadd.s32 1, %s1358_s29 }
  0x4e   : > { %1777 = sst [smem:[#allocation17_spill]] %s1544_s16  ;;  %s32_s21 = ssub.s32 %s1362_s30, %s1544_s16 }
  0x4f   : > { %p42_p13 = scmp.ne.s32.totalorder %s1358_s29, %s1354_s28  ;;  %p33_p6 = scmp.eq.s32.totalorder %s32_s21, 0 }
  0x50   : > { %p43_p10 = scmp.eq.s32.totalorder %s1362_s30, 0  ;;  %p1778_p3 = scmp.eq.s32.totalorder %s1449_s9, 1 }
  0x51   : > { %p1084_p7 = scmp.lt.s32.totalorder %s1362_s30, 2  ;;  %s1563_s24 = sand.u32 1, %s1358_s29  }
  0x52   : > { %p1554_p5 = por %p1778_p3, %p42_p13  ;;  %p44_p9 = por %p43_p10, %p42_p13 }
  0x53   : > { %s1560_s23 = scalar_select %p33_p6, %s1358_s29, %s35_s20  }
  0x54   : > { %s1779_s22 = scalar_select %p1554_p5, 1, 0 }
  0x55   : > { %1780 = sst [smem:[#allocation18_spill]] %s1560_s23  ;;  %s969_s18 = sshll.u32 %s1563_s24, 3 }
  0x56   : > { %s1005_s25 = sshll.u32 %s1362_s30, 7  ;;  %s1781_s0 = sld [smem:[#allocation19_spill]] }
  0x57   : > { %s292_s19 = scalar_lea.vmem [#allocation2], %s969_s18  ;;  %p1574_p11 = pnand %p1084_p7, %p44_p9 }
  0x58   : > { %s299_s20 = sshll.u32 %s292_s19, 4  ;;  %s972_s14 = sshll.u32 %s1563_s24, 2  ;;  %s1572_s20 = int_to_ptr.vmem [resolvable:$true] %s299_s20 }
  0x59   : > { %s289_s2 = scalar_lea.sflag [#allocation3], %s1563_s24  ;;  %p1226_p0 = pneg %p1574_p11 }
  0x5c   : > { %s1570_s17 = scalar_lea.hbm %s1781_s0, %s1005_s25  ;;  %s1229_s15 = scalar_lea.hbm %s1781_s0, 256 }
  0x5d   : > { %s1224_s26 = scalar_lea.hbm %s1570_s17, 128  ;;  %p1230_p13 = scmp.lt.u32.totalorder %s1570_s17, %s1781_s0 }
  0x5e   : > { %p1225_p12 = scmp.ne.s32.totalorder %s1570_s17, %s1224_s26  ;;  %p1231_p6 = scmp.lt.u32.totalorder %s1229_s15, %s1224_s26 }
  0x5f   : > { %p1233_p3 = scmp.lt.u32.totalorder %s1224_s26, %s1570_s17 }
  0x60   : > { %p1227_p1 = pnand %p1226_p0, %p1225_p12  ;;  %p1232_p10 = por %p1231_p6, %p1230_p13 }
  0x62   : > { %p1228_p2 = pneg %p1227_p1  ;;  %p1234_p7 = por %p1233_p3, %p1232_p10 }
  0x64   : > { %p1235_p9 = pnand %p1234_p7, %p1228_p2 }
  0x66   : > { %1238 = shalt.err (!%p1235_p9)
}
  0x67   : > { %s1239_s10 = scalar_lea.vmem %s1572_s20, 128  ;;  %s1368_s18 = smov [#allocation2]  }
  0x68   : > { %p1240_p12 = scmp.ne.s32.totalorder %s1572_s20, %s1239_s10  ;;  %s1244_s25 = sshll.u32 %s1368_s18, 4  ;;  %s1245_s25 = int_to_ptr.vmem [resolvable:$false] %s1244_s25 }
  0x69   : > { %s1246_s4 = scalar_lea.vmem %s1245_s25, 256  ;;  %p1247_p4 = scmp.lt.s32.totalorder %s1572_s20, %s1245_s25 }
  0x6a   : > { %p1242_p1 = pnand %p1240_p12, %p1226_p0  ;;  %p1248_p13 = scmp.lt.s32.totalorder %s1246_s4, %s1239_s10 }
  0x6c   : > { %p1243_p5 = pneg %p1242_p1  ;;  %p1249_p6 = por %p1248_p13, %p1247_p4 }
  0x6e   : > { %p1250_p10 = pnand %p1249_p6, %p1243_p5 }
  0x70   : > { %1253 = shalt.err (!%p1250_p10)
}
  0x71   : > { %s1783_s26 = smov 4   ;;  %s1784_s15 = smov 64  }
  0x72   : > { %1074 = dma.hbm_to_vmem [thread:$0]  (!%p1574_p11), %s1570_s17, 128, %s1572_s20, %s289_s2, %s1784_s15, %s1784_s15, %s1783_s26  }
  0x73   : > { %s973_s19 = sshll.u32 %s1362_s30, 6  ;;  %s313_s4 = scalar_lea.vmem [#allocation5], %s972_s14 }
  0x74   : > { %s1615_s25 = scalar_lea.hbm %s1750_s1, %s973_s19  ;;  %s320_s0 = sshll.u32 %s313_s4, 4  ;;  %s321_s0 = int_to_ptr.vmem [resolvable:$true] %s320_s0 }
  0x75   : > { %s1785_s23 = sand.u32 1, %s1362_s30   ;;  %s1254_s16 = scalar_lea.hbm %s1615_s25, 64 }
  0x76   : > { %s310_s29 = scalar_lea.sflag [#allocation6], %s1785_s23  ;;  %p1255_p4 = scmp.ne.s32.totalorder %s1615_s25, %s1254_s16 }
  0x77   : > { %s1259_s20 = scalar_lea.hbm %s1750_s1, 128  ;;  %p1260_p3 = scmp.lt.u32.totalorder %s1615_s25, %s1750_s1 }
  0x78   : > { %p1257_p5 = pnand %p1255_p4, %p1226_p0  ;;  %p1261_p7 = scmp.lt.u32.totalorder %s1259_s20, %s1254_s16 }
  0x79   : > { %p1263_p12 = scmp.lt.u32.totalorder %s1254_s16, %s1615_s25 }
  0x7a   : > { %p1258_p2 = pneg %p1257_p5  ;;  %p1262_p9 = por %p1261_p7, %p1260_p3 }
  0x7c   : > { %p1264_p1 = por %p1263_p12, %p1262_p9 }
  0x7e   : > { %p1265_p13 = pnand %p1264_p1, %p1258_p2 }
  0x80   : > { %1268 = shalt.err (!%p1265_p13)
}
  0x81   : > { %s1269_s14 = scalar_lea.vmem %s321_s0, 64  ;;  %s1369_s23 = smov [#allocation5]  }
  0x82   : > { %p1270_p6 = scmp.ne.s32.totalorder %s321_s0, %s1269_s14  ;;  %s1274_s15 = sshll.u32 %s1369_s23, 4  ;;  %s1275_s15 = int_to_ptr.vmem [resolvable:$false] %s1274_s15 }
  0x83   : > { %s1276_s19 = scalar_lea.vmem %s1275_s15, 128  ;;  %p1277_p5 = scmp.lt.s32.totalorder %s321_s0, %s1275_s15 }
  0x84   : > { %p1272_p10 = pnand %p1270_p6, %p1226_p0  ;;  %p1278_p8 = scmp.lt.s32.totalorder %s1276_s19, %s1269_s14 }
  0x86   : > { %p1273_p4 = pneg %p1272_p10  ;;  %p1279_p3 = por %p1278_p8, %p1277_p5 }
  0x88   : > { %p1280_p7 = pnand %p1279_p3, %p1273_p4 }
  0x8a   : > { %1283 = shalt.err (!%p1280_p7)
}
  0x8b   : > { %1077 = dma.hbm_to_vmem [thread:$0]  (!%p1574_p11), %s1615_s25, 64, %s321_s0, %s310_s29  }
  0x8c   : > { %p1786_p2 = scmp.ne.s32.totalorder %s1773_s13, 0 }
  0x8d   : > { %s1643_s16 = sand.u32 (!%p1786_p2), 1, %s1354_s28   ;;  %p1787_p8 = scmp.ne.s32.totalorder (!%p1786_p2), %s1771_s11, 0 }
  0x8e   : > { %329 = sbr.rel (%p1786_p2) target bundleno = 821 (0x335), region = 52  ;;  %s975_s18 = sshll.u32 (!%p1786_p2), %s1643_s16, 3 }
  0x8f   : > { %s332_s10 = scalar_lea.sflag (!%p1786_p2), [#allocation3], %s1643_s16  ;;  %s335_s4 = scalar_lea.vmem (!%p1786_p2), [#allocation2], %s975_s18 }
  0x95   : > { %1329 = dma.done.wait (%p1787_p8), %s332_s10, 128  }
  0x96   : > { %1331 = vsyncadd (%p1787_p8), %s332_s10, 4294967168  ;;  %s340_s0 = sand.u32 1, %s1449_s9   ;;  %s976_s29 = sshll.u32 %s1643_s16, 2 }
  0x97   : > { %s341_s13 = scalar_lea.sflag [#allocation6], %s340_s0  ;;  %s344_s21 = scalar_lea.vmem [#allocation5], %s976_s29 }
  0x98   : > { %1333 = dma.done.wait (%p1787_p8), %s341_s13, 64  }
  0x99   : > { %1335 = vsyncadd (%p1787_p8), %s341_s13, 4294967232  ;;  %p1788_p11 = scmp.eq.s32.totalorder %s1449_s9, 0 }
  0x9b   : > { %1337 = dma.done.wait (%p1788_p11), [#allocation6], 256   ;;  %p1789_p0 = pmov %p1788_p11 }
  0x9d   : > { %1339 = vsyncadd (%p1789_p0), [#allocation6], 4294967040  ;;  %p1790_p9 = pmov %p1789_p0 }
  0x9e   : > { %p1791_p12 = pmov %p1789_p0 }
  0x9f   : > { %1341 = dma.done.wait (%p1790_p9), [#allocation9], 256  }
  0xa0   : > { %1343 = vsyncadd (%p1791_p12), [#allocation9], 4294967040  ;;  %v1370_v0 = vmov 0.0   ;;  %vm1371_vm0 = vmmov 0   ;;  %v1152_v1 = vld [vmem:[#allocation8] sm:$0xff]   ;;  %v1153_v2 = vld [vmem:[#allocation7] sm:$0xff]   ;;  %v702_v47 = vlaneseq }
  0xa1   : > { %1029 = vmatprep.subr.bf16.mxu1 %v1370_v0  ;;  %1021 = vmatprep.subr.bf16.mxu0 %v1370_v0  ;;  %v1154_v3 = vld [vmem:[#allocation8 + $0x8] sm:$0xff]   ;;  %v1155_v4 = vld [vmem:[#allocation7 + $0x8] sm:$0xff]   ;;  %vm422_vm1 = vcmask 261120   ;;  %v1158_v8 = vld [vmem:[%s1755_s6 + $0x8] sm:$0xff]   ;;  %v1372_v22 = vmov 1   ;;  %v1373_v23 = vmov 0  }
  0xa2   : > { %1033 = vmatprep.mubr.msk.bf16.mxu1 %vm1371_vm0, %v1370_v0  ;;  %1025 = vmatprep.mubr.msk.bf16.mxu0 %vm1371_vm0, %v1370_v0  ;;  %v1669_v5 = vld [vmem:[%s335_s4] sm:$0xff]   ;;  %v393_v6 = vld [vmem:[%s344_s21] sm:$0xf]  ;;  %v1374_v37 = vmov 2   ;;  %v1375_v38 = vmov 3   ;;  %v1376_v40 = vmov 4  }
  0xa3   : > { %1030 = vmatpush3.bf16.msra.mxu1 %v1152_v1  ;;  %1022 = vmatpush3.bf16.msra.mxu0 %v1153_v2  ;;  %v1157_v7 = vld [vmem:[%s1755_s6] sm:$0xff]   ;;  %v1377_v41 = vmov 5   ;;  %v1378_v42 = vmov 6   ;;  %v1379_v43 = vmov 7   ;;  %v703_v50 = vshrl.u32 %v702_v47, 7  ;;  %s1008_s19 = sshll.u32 %s1449_s9, 7 }
  0xa4   : > { %1031 = vmatprep.subr.bf16.mxu1 %v1370_v0  ;;  %1023 = vmatprep.subr.bf16.mxu0 %v1370_v0  ;;  %v985_v9 = vld [vmem:[%s1754_s5] ss:$0 sm:$0xff]  ;;  %v821_v47 = vunpack.c.h.bf16 %v1669_v5  ;;  %vm832_vm2 = vcmask 257024   ;;  %s389_s10 = scalar_lea.vmem [#allocation10], %s975_s18  ;;  %s1703_s13 = scalar_lea.hbm %s1757_s8, %s1008_s19 }
  0xa5   : > { %v980_v10 = vld [vmem:[%s1752_s3] ss:$0 sm:$0xff]  ;;  %1137 = vset.pattern.permute.xlu1 %v1372_v22  ;;  %1136 = vset.pattern.permute.xlu0 %v1373_v23  ;;  %v718_v53 = vsub.s32 1, %v703_v50  ;;  %v704_v54 = vsub.s32 0, %v703_v50  ;;  %v734_v59 = vsub.s32 2, %v703_v50  ;;  %v750_v61 = vsub.s32 3, %v703_v50 }
  0xa6   : > { %v989_v51 = vld [vmem:[%s1756_s7] ss:$0 sm:$0xff]  ;;  %s849_s4 = sshll.u32 %s389_s10, 4  ;;  %s836_s21 = scalar_lea.sflag [#allocation4], %s1643_s16  ;;  %s1705_s4 = int_to_ptr.vmem [resolvable:$true] %s849_s4 }
  0xa7   : > { %1032 = vmatpush3.bf16.msra.mxu1 %v1154_v3  ;;  %1024 = vmatpush3.bf16.msra.mxu0 %v1155_v4  ;;  %v766_v4 = vsub.s32 4, %v703_v50  ;;  %s1284_s11 = scalar_lea.vmem %s1705_s4, 128  ;;  %p1792_p13 = scmp.ne.s32.totalorder %s1779_s22, 0 }
  0xa8   : > { %1037 = vmatprep.subr.bf16.mxu0 %v1370_v0  ;;  %p1285_p1 = scmp.ne.s32.totalorder %s1705_s4, %s1284_s11  ;;  %s1380_s9 = smov [#allocation10]  }
  0xa9   : > { %s1288_s18 = sshll.u32 %s1380_s9, 4  ;;  %s1289_s18 = int_to_ptr.vmem [resolvable:$false] %s1288_s18 }
  0xaa   : > { %1034 = vmatmul.mubr.msk.bf16.vlgmr.msra.gmra.mrb[0].mxu1 %vm422_vm1, %v393_v6  ;;  %1026 = vmatmul.mubr.msk.bf16.vlgmr.msra.gmra.mrb[0].mxu0 %vm422_vm1, %v1669_v5  ;;  %p1286_p6 = pnand %p1285_p1, %p1792_p13  ;;  %s1290_s25 = scalar_lea.vmem %s1289_s18, 256 }
  0xab   : > { %1041 = vmatprep.mubr.msk.bf16.mxu0 %vm1371_vm0, %v1370_v0  ;;  %1038 = vmatpush3.bf16.msra.mxu0 %v1157_v7  ;;  %p1291_p4 = scmp.lt.s32.totalorder %s1705_s4, %s1289_s18  ;;  %p1292_p5 = scmp.lt.s32.totalorder %s1290_s25, %s1284_s11 }
  0xac   : > { %1039 = vmatprep.subr.bf16.mxu0 %v1370_v0  ;;  %p1287_p10 = pneg %p1286_p6 }
  0xad   : > { %p1293_p3 = por %p1292_p5, %p1291_p4 }
  0xaf   : > { %1040 = vmatpush3.bf16.msra.mxu0 %v1158_v8  ;;  %p1294_p7 = pnand %p1293_p3, %p1287_p10 }
  0xb2   : > { %1042 = vmatmul.mubr.msk.bf16.vlgmr.msra.gmra.mrb[4].mxu0 %vm422_vm1, %v393_v6 }
 0x17d   : > { %v527_v11 = vpop.f32.mrb[0].mxu1  ;;  %v460_v14 = vpop.f32.mrb[0].mxu0 }
 0x17e   : > { %v528_v12 = vadd.f32 %v985_v9, %v527_v11  ;;  %v1035_v13 = vpop.f32.mrb[1].mxu1  ;;  %v461_v15 = vadd.f32 %v980_v10, %v460_v14  ;;  %v1027_v17 = vpop.f32.mrb[1].mxu0  ;;  %v782_v14 = vsub.s32 5, %v703_v50 }
 0x17f   : > { %v530_v16 = vpop.f32.mrb[2].mxu1  ;;  %v463_v19 = vpop.f32.mrb[2].mxu0 }
 0x180   : > { %v1036_v18 = vpop.f32.mrb[3].mxu1  ;;  %1045 = vmatprep.subr.msk.mxu1 %vm422_vm1, %v528_v12  ;;  %1047 = vmatprep.mubr.msk.f32.mxu1 %vm422_vm1, %v461_v15  ;;  %v1028_v20 = vpop.f32.mrb[3].mxu0  ;;  %v464_v21 = vadd.f32 %v980_v10, %v463_v19 }
 0x181   : > { %1046 = vmatpush3.xpose.msk.msra.mxu1 %vm422_vm1, %v528_v12  ;;  %v798_v18 = vsub.s32 6, %v703_v50 }
 0x184   : > { %1048 = vmatmul.mubr.msk.f32.vlgmr.msra.gmra.mrb[4].mxu1 %vm422_vm1, %v464_v21 }
 0x185   : > { %v590_v24 = vpop.f32.mrb[4].mxu0 }
 0x186   : > { %v1043_v25 = vpop.f32.mrb[5].mxu0  ;;  %v591_v52 = vadd.f32 %v989_v51, %v590_v24 }
 0x187   : > { %v593_v26 = vpop.f32.mrb[6].mxu0 }
 0x188   : > { %v1044_v27 = vpop.f32.mrb[7].mxu0  ;;  %v719_v57 = vrot.slane %v591_v52, %v718_v53  ;;  %v705_v58 = vrot.slane %v591_v52, %v704_v54  ;;  %v735_v1 = vrot.slane %v591_v52, %v734_v59  ;;  %v751_v3 = vrot.slane %v591_v52, %v750_v61 }
 0x189   : > { %v767_v13 = vrot.slane %v591_v52, %v766_v4  ;;  %v799_v26 = vrot.slane %v591_v52, %v798_v18 }
 0x257   : > { %v1049_v28 = vpop.f32.mrb[4].mxu1 }
 0x258   : > { %v997_v29 = vmul.f32 -1.442695, %v1049_v28  ;;  %v671_v30 = vpop.f32.mrb[5].mxu1  ;;  %v814_v28 = vsub.s32 7, %v703_v50 }
 0x259   : > { %v996_v31 = vmul.f32 -1.442695, %v671_v30 }
 0x25a   : > { %1160 = vpow2.f32 %v997_v29 }
 0x25b   : > { %1162 = vpow2.f32 %v996_v31 }
 0x264   : > { %v1161_v32 = vpop.eup %1160 }
 0x265   : > { %v687_v33 = vadd.f32 1.0, %v1161_v32  ;;  %v1163_v34 = vpop.eup %1162 }
 0x266   : > { %v686_v35 = vadd.f32 1.0, %v1163_v34 }
 0x267   : > { %1164 = vrcp.f32 %v687_v33 }
 0x268   : > { %1166 = vrcp.f32 %v686_v35  ;;  %v815_v35 = vrot.slane %v591_v52, %v814_v28 }
 0x271   : > { %v1165_v36 = vpop.eup %1164 }
 0x272   : > { %713 = vperm.xlu1 %1137, %v1165_v36   ;;  %699 = vperm.xlu0 %1136, %v1165_v36   ;;  %v1167_v39 = vpop.eup %1166 }
 0x276   : > { %1138 = vset.pattern.permute.xlu1 %v1374_v37  ;;  %1139 = vset.pattern.permute.xlu0 %v1375_v38 }
 0x277   : > { %729 = vperm.xlu1 %1138, %v1165_v36   ;;  %745 = vperm.xlu0 %1139, %v1165_v36  }
 0x27b   : > { %1140 = vset.pattern.permute.xlu1 %v1376_v40  ;;  %1142 = vset.pattern.permute.xlu0 %v1373_v23 }
 0x27c   : > { %761 = vperm.xlu1 %1140, %v1165_v36   ;;  %694 = vperm.xlu0 %1142, %v1167_v39  }
 0x280   : > { %1141 = vset.pattern.permute.xlu1 %v1377_v41  ;;  %1144 = vset.pattern.permute.xlu0 %v1374_v37 }
 0x281   : > { %777 = vperm.xlu1 %1141, %v1165_v36   ;;  %725 = vperm.xlu0 %1144, %v1167_v39  }
 0x285   : > { %1143 = vset.pattern.permute.xlu1 %v1372_v22  ;;  %1147 = vset.pattern.permute.xlu0 %v1377_v41  ;;  %v783_v22 = vrot.slane %v591_v52, %v782_v14 }
 0x286   : > { %709 = vperm.xlu1 %1143, %v1167_v39   ;;  %773 = vperm.xlu0 %1147, %v1167_v39  }
 0x28a   : > { %1145 = vset.pattern.permute.xlu1 %v1375_v38  ;;  %1149 = vset.pattern.permute.xlu0 %v1378_v42 }
 0x28b   : > { %741 = vperm.xlu1 %1145, %v1167_v39   ;;  %793 = vperm.xlu0 %1149, %v1165_v36  }
 0x28f   : > { %1146 = vset.pattern.permute.xlu1 %v1376_v40  ;;  %1151 = vset.pattern.permute.xlu0 %v1379_v43 }
 0x290   : > { %757 = vperm.xlu1 %1146, %v1167_v39  }
 0x294   : > { %1148 = vset.pattern.permute.xlu1 %v1378_v42 }
 0x295   : > { %789 = vperm.xlu1 %1148, %v1167_v39  }
 0x299   : > { %1150 = vset.pattern.permute.xlu1 %v1379_v43 }
 0x29a   : > { %805 = vperm.xlu1 %1150, %v1167_v39  }
 0x29e   : > { %809 = vperm.xlu1 %1150, %v1165_v36   ;;  %v820_v36 = vunpack.c.l.bf16 %v1669_v5 }
 0x2f1   : > { %v714_v44 = vpop.permute.xlu1 %713  ;;  %v700_v45 = vpop.permute.xlu0 %699 }
 0x2f2   : > { %v721_v8 = vmul.f32 %v719_v57, %v714_v44  ;;  %v707_v9 = vmul.f32 %v705_v58, %v700_v45 }
 0x2f4   : > { %v723_v16 = vadd.f32 %v721_v8, %v707_v9 }
 0x2f6   : > { %v730_v46 = vpop.permute.xlu1 %729  ;;  %v746_v48 = vpop.permute.xlu0 %745 }
 0x2f7   : > { %v737_v12 = vmul.f32 %v735_v1, %v730_v46  ;;  %v753_v24 = vmul.f32 %v751_v3, %v746_v48 }
 0x2f9   : > { %v739_v21 = vadd.f32 %v737_v12, %v723_v16 }
 0x2fb   : > { %v762_v49 = vpop.permute.xlu1 %761  ;;  %v695_v56 = vpop.permute.xlu0 %694  ;;  %v755_v29 = vadd.f32 %v753_v24, %v739_v21 }
 0x2fc   : > { %v706_v62 = vmul.f32 %v705_v58, %v695_v56  ;;  %v769_v30 = vmul.f32 %v767_v13, %v762_v49 }
 0x2fe   : > { %v771_v38 = vadd.f32 %v769_v30, %v755_v29 }
 0x300   : > { %v778_v55 = vpop.permute.xlu1 %777  ;;  %v726_v0 = vpop.permute.xlu0 %725 }
 0x301   : > { %v736_v6 = vmul.f32 %v735_v1, %v726_v0  ;;  %v785_v34 = vmul.f32 %v783_v22, %v778_v55 }
 0x303   : > { %v787_v42 = vadd.f32 %v785_v34, %v771_v38 }
 0x305   : > { %v710_v60 = vpop.permute.xlu1 %709  ;;  %v774_v20 = vpop.permute.xlu0 %773 }
 0x306   : > { %v720_v63 = vmul.f32 %v719_v57, %v710_v60  ;;  %v784_v25 = vmul.f32 %v783_v22, %v774_v20 }
 0x308   : > { %v722_v2 = vadd.f32 %v720_v63, %v706_v62 }
 0x30a   : > { %v742_v7 = vpop.permute.xlu1 %741  ;;  %v738_v10 = vadd.f32 %v736_v6, %v722_v2  ;;  %v794_v33 = vpop.permute.xlu0 %793 }
 0x30b   : > { %v752_v11 = vmul.f32 %v751_v3, %v742_v7  ;;  %v801_v39 = vmul.f32 %v799_v26, %v794_v33 }
 0x30d   : > { %v754_v17 = vadd.f32 %v752_v11, %v738_v10  ;;  %v803_v45 = vadd.f32 %v801_v39, %v787_v42 }
 0x30f   : > { %v758_v15 = vpop.permute.xlu1 %757 }
 0x310   : > { %v768_v19 = vmul.f32 %v767_v13, %v758_v15 }
 0x312   : > { %v770_v23 = vadd.f32 %v768_v19, %v754_v17 }
 0x314   : > { %v790_v27 = vpop.permute.xlu1 %789  ;;  %v786_v31 = vadd.f32 %v784_v25, %v770_v23 }
 0x315   : > { %v800_v32 = vmul.f32 %v799_v26, %v790_v27 }
 0x317   : > { %v802_v40 = vadd.f32 %v800_v32, %v786_v31 }
 0x319   : > { %v806_v37 = vpop.permute.xlu1 %805 }
 0x31a   : > { %v816_v41 = vmul.f32 %v815_v35, %v806_v37 }
 0x31c   : > { %v818_v43 = vadd.f32 %v816_v41, %v802_v40 }
 0x31d   : > { %v810_v44 = vpop.permute.xlu1 %809 }
 0x31e   : > { %v822_v46 = vadd.f32 %v820_v36, %v818_v43  ;;  %v817_v48 = vmul.f32 %v815_v35, %v810_v44 }
 0x320   : > { %v1006_v49 = vpack.c.bf16 %v822_v46, %v822_v46  ;;  %v819_v50 = vadd.f32 %v817_v48, %v803_v45 }
 0x322   : > { %833 = vst.msk [vmem:[%s389_s10] sm:$0xf] %vm832_vm2, %v1006_v49  ;;  %v823_v51 = vadd.f32 %v821_v47, %v819_v50 }
 0x324   : > { %v1007_v5 = vpack.c.bf16 %v823_v51, %v823_v51 }
 0x326   : > { %834 = vst.msk [vmem:[%s389_s10 + $0x4] sm:$0xf] %vm832_vm2, %v1007_v5 }
 0x327   : > { %1297 = shalt.err (!%p1294_p7)
}
 0x328   : > { %s1298_s2 = scalar_lea.hbm %s1703_s13, 128  ;;  %s1302_s24 = scalar_lea.hbm %s1757_s8, 256 }
 0x329   : > { %p1299_p2 = scmp.ne.s32.totalorder %s1703_s13, %s1298_s2  ;;  %p1303_p0 = scmp.lt.u32.totalorder %s1703_s13, %s1757_s8 }
 0x32a   : > { %p1304_p9 = scmp.lt.u32.totalorder %s1302_s24, %s1298_s2  ;;  %p1306_p1 = scmp.lt.u32.totalorder %s1298_s2, %s1703_s13 }
 0x32b   : > { %p1300_p8 = pnand %p1299_p2, %p1792_p13 }
 0x32c   : > { %p1305_p12 = por %p1304_p9, %p1303_p0 }
 0x32d   : > { %p1301_p11 = pneg %p1300_p8 }
 0x32e   : > { %p1307_p6 = por %p1306_p1, %p1305_p12 }
 0x330   : > { %p1308_p10 = pnand %p1307_p6, %p1301_p11 }
 0x332   : > { %1311 = shalt.err (!%p1308_p10)
}
 0x333   : > { %s1381_s23 = smov 64   ;;  %s1382_s15 = smov 4  }
 0x334   : > { %1062 = dma.vmem_to_hbm [thread:$0]  (%p1792_p13), %s1705_s4, 128, %s1703_s13, %s836_s21, %s1381_s23, %s1381_s23, %s1382_s15  }
 0x335 PF: > { %s864_s19 = sand.u32 1, %s1350_s27   ;;  %p1793_p4 = scmp.ne.s32.totalorder %s1772_s12, 0 }
 0x336   : > { %p1794_p5 = scmp.ge.s32.totalorder %s1362_s30, 2  ;;  %s865_s10 = scalar_lea.sflag [#allocation4], %s864_s19 }
 0x338   : > { %p1079_p3 = pnand %p1794_p5, %p1793_p4 }
 0x33a   : > { %1345 = dma.done.wait (!%p1079_p3), %s865_s10, 128  }
 0x33b   : > { %1347 = vsyncadd (!%p1079_p3), %s865_s10, 4294967168  ;;  %s1795_s30 = sld [smem:[#allocation17_spill]]  ;;  %s1796_s0 = sld [smem:[#allocation16_spill]] }
 0x33c   : > { %s1797_s29 = sld [smem:[#allocation18_spill]]  ;;  %s1798_s27 = smov %s1354_s28 }
 0x341   : > { %p25_p7 = scmp.ge.s32.totalorder %s1795_s30, 4   ;;  %s1799_s28 = smov %s1796_s0 }
 0x343   :  { %27 = sbr.rel (!%p25_p7) target bundleno = 12 (0xc), region = 118 }
 0x34a   :  { %870 = vsyncpa [#allocation3], 1 }
 0x34b   :  { %872 = vsyncpa [#allocation3 + $0x1], 1 }
 0x34c   :  { %873 = vsyncpa [#allocation6], 1 }
 0x34d   :  { %875 = vsyncpa [#allocation6 + $0x1], 1 }
 0x34e   :  { %876 = vsyncpa [#allocation9], 1 }
 0x34f   :  { %877 = vsyncpa [#allocation4], 1 }
 0x350   :  { %879 = vsyncpa [#allocation4 + $0x1], 1 }

</bundles_post_ra>
